<compile_context>
chip_gen: v5e
topology: v5e:2x2
jax: 0.10.0
libtpu: 0.0.40
codegen_flags: <defaults>
</compile_context>

<pallas_src>
import jax
import jax.numpy as jnp
from jax.experimental import pallas as pl
from jax.experimental.pallas import tpu as pltpu

LANE = 128
N_OUT = 2  # nn.Linear(hidden_size, 2)


def _round_up(n, m):
    return ((n + m - 1) // m) * m


# ------------------------------ Pallas kernel --------------------------------

def _sent140_rnn_kernel(ids_ref, h0_ref, emb_hbm, wih_ref, whh_ref, brnn_ref,
                        wfc_ref, bfc_ref, out_ref, xbuf, sem):
    """h_t = tanh(x_t@WihT + h_{t-1}@WhhT + b);  out = h_T@WfcT + bfc.

    ids_ref : SMEM (B, T)       int32 token ids
    h0_ref  : VMEM (B, H)       f32   initial hidden state
    emb_hbm : HBM  (V, Dpad)    f32   embedding table (lane-padded), DMA-gathered
    wih_ref : VMEM (Dpad, H)    bf16  W_ih^T (zero-padded rows)
    whh_ref : VMEM (H, H)       bf16  W_hh^T
    brnn_ref: VMEM (1, H)       f32   b_ih + b_hh
    wfc_ref : VMEM (H, Npad)    bf16  W_fc^T (zero-padded cols)
    bfc_ref : VMEM (1, Npad)    f32
    out_ref : VMEM (B, Npad)    f32   lane-dense logits (cols >= 2 are zero)
    xbuf    : VMEM (2, B, Dpad) f32   double-buffered embedded rows
    sem     : DMA semaphores (2, B)
    """
    B, T = ids_ref.shape

    def fetch(t, slot):
        # Gather the B embedding rows for time step t (scalar ids from SMEM
        # drive per-row HBM->VMEM DMAs into the given buffer slot).
        for b in range(B):
            tok = ids_ref[b, t]
            pltpu.make_async_copy(
                emb_hbm.at[pl.ds(tok, 1), :],
                xbuf.at[slot, pl.ds(b, 1), :],
                sem.at[slot, b],
            ).start()

    def wait(slot):
        for b in range(B):
            pltpu.make_async_copy(
                emb_hbm.at[pl.ds(0, 1), :],
                xbuf.at[slot, pl.ds(b, 1), :],
                sem.at[slot, b],
            ).wait()

    # Prime the pipeline with step 0's rows.
    fetch(0, 0)

    # Weights stay resident; hoist the loads out of the time loop.
    wih = wih_ref[...]
    whh = whh_ref[...]
    b_rnn = brnn_ref[...]
    h = h0_ref[...]

    for t in range(T):                      # T is static -> fully unrolled
        slot = t & 1
        if t + 1 < T:
            fetch(t + 1, 1 - slot)          # prefetch next step before blocking
        wait(slot)
        x_t = xbuf[slot].astype(jnp.bfloat16)
        pre = (jnp.dot(x_t, wih, preferred_element_type=jnp.float32)
               + jnp.dot(h.astype(jnp.bfloat16), whh,
                         preferred_element_type=jnp.float32)
               + b_rnn)
        h = jnp.tanh(pre)

    # fc epilogue, lane-dense padded output.
    out_ref[...] = (jnp.dot(h.astype(jnp.bfloat16), wfc_ref[...],
                            preferred_element_type=jnp.float32)
                    + bfc_ref[...])


# ------------------------------ parameters -----------------------------------

def init_torch_params(key, s_vocab, d_embed, hidden):
    """Parameters in PyTorch layout (mirrors Sent140_RNN.state_dict())."""
    ks = jax.random.split(key, 7)

    def uni(k, shape, fan_in):
        bound = 1.0 / jnp.sqrt(jnp.float32(fan_in))
        return jax.random.uniform(k, shape, jnp.float32, -bound, bound)

    return {
        "emb_weight": jax.random.normal(ks[0], (s_vocab, d_embed), jnp.float32),
        "w_ih": uni(ks[1], (hidden, d_embed), hidden),   # nn.RNN weight_ih_l0
        "w_hh": uni(ks[2], (hidden, hidden), hidden),    # nn.RNN weight_hh_l0
        "b_ih": uni(ks[3], (hidden,), hidden),
        "b_hh": uni(ks[4], (hidden,), hidden),
        "fc_w": uni(ks[5], (N_OUT, hidden), hidden),     # nn.Linear weight
        "fc_b": uni(ks[6], (N_OUT,), hidden),
    }


def prepare_kernel_params(p):
    """One-time re-layout: transpose, lane-pad to 128, cast MXU operands to bf16."""
    V, D = p["emb_weight"].shape
    H = p["w_hh"].shape[0]
    Dpad = _round_up(D, LANE)
    Npad = _round_up(N_OUT, LANE)

    emb = jnp.zeros((V, Dpad), jnp.float32).at[:, :D].set(p["emb_weight"])
    wih_t = (jnp.zeros((Dpad, H), jnp.float32)
             .at[:D, :].set(p["w_ih"].T).astype(jnp.bfloat16))
    whh_t = p["w_hh"].T.astype(jnp.bfloat16)
    b_rnn = (p["b_ih"] + p["b_hh"]).reshape(1, H).astype(jnp.float32)
    wfc_t = (jnp.zeros((H, Npad), jnp.float32)
             .at[:, :N_OUT].set(p["fc_w"].T).astype(jnp.bfloat16))
    b_fc = jnp.zeros((1, Npad), jnp.float32).at[0, :N_OUT].set(p["fc_b"])
    return {"emb": emb, "wih_t": wih_t, "whh_t": whh_t, "b_rnn": b_rnn,
            "wfc_t": wfc_t, "b_fc": b_fc}


# ------------------------------ forward wrapper -------------------------------

@jax.jit
def sent140_rnn_forward(kparams, x_ids, h0):
    """x_ids: (B, T) int32 token ids (the PyTorch module transposes to (T, B)
    internally); h0: (1, B, H) f32. Returns (B, 2) logits, matching
    self.fc(hidden.squeeze(0))."""
    B, T = x_ids.shape
    H = kparams["whh_t"].shape[0]
    Dpad = kparams["emb"].shape[-1]
    Npad = kparams["wfc_t"].shape[-1]

    vmem = pl.BlockSpec(memory_space=pltpu.MemorySpace.VMEM)
    smem = pl.BlockSpec(memory_space=pltpu.MemorySpace.SMEM)
    hbm = pl.BlockSpec(memory_space=pl.ANY)   # embedding table stays in HBM

    out_pad = pl.pallas_call(
        _sent140_rnn_kernel,
        out_shape=jax.ShapeDtypeStruct((B, Npad), jnp.float32),
        in_specs=[smem, vmem, hbm, vmem, vmem, vmem, vmem, vmem],
        out_specs=vmem,
        scratch_shapes=[
            pltpu.VMEM((2, B, Dpad), jnp.float32),   # double-buffered x_t rows
            pltpu.SemaphoreType.DMA((2, B)),
        ],
    )(x_ids.astype(jnp.int32),
      h0.reshape(B, H).astype(jnp.float32),
      kparams["emb"], kparams["wih_t"], kparams["whh_t"], kparams["b_rnn"],
      kparams["wfc_t"], kparams["b_fc"])
    return out_pad[:, :N_OUT]


# ------------------------------ pure-JAX reference ----------------------------

def reference_forward(p, x_ids, h0):
    """Mirror of the PyTorch forward (with the kernel's bf16 operand casts so
    the comparison is tight)."""
    B, T = x_ids.shape
    xs = jnp.transpose(x_ids, (1, 0))                  # torch.transpose(x, 0, 1)
    xe = p["emb_weight"][xs]                           # (T, B, D)
    wih_t = p["w_ih"].T.astype(jnp.bfloat16)
    whh_t = p["w_hh"].T.astype(jnp.bfloat16)
    b = (p["b_ih"] + p["b_hh"]).astype(jnp.float32)
    h = h0.reshape(B, -1).astype(jnp.float32)
    for t in range(T):
        pre = (jnp.dot(xe[t].astype(jnp.bfloat16), wih_t,
                       preferred_element_type=jnp.float32)
               + jnp.dot(h.astype(jnp.bfloat16), whh_t,
                         preferred_element_type=jnp.float32)
               + b)
        h = jnp.tanh(pre)
    return (jnp.dot(h.astype(jnp.bfloat16), p["fc_w"].T.astype(jnp.bfloat16),
                    preferred_element_type=jnp.float32)
            + p["fc_b"])


# ------------------------------ main ------------------------------------------

if __name__ == "__main__":
    key = jax.random.PRNGKey(0)
    kp, kx, kh = jax.random.split(key, 3)

    # Small, self-contained shapes consistent with the module:
    #   batch=2, seq=8, hidden=128 (module default), d_embed=100 (module default).
    # Vocab reduced to 1000 to keep the demo fast; the HBM-resident table +
    # DMA gather used by the kernel scales unchanged to the real 87093 vocab.
    B, T, HIDDEN, D_EMBED, VOCAB = 2, 8, 128, 100, 1000

    torch_params = init_torch_params(kp, VOCAB, D_EMBED, HIDDEN)
    kparams = prepare_kernel_params(torch_params)

    x_ids = jax.random.randint(kx, (B, T), 0, VOCAB, dtype=jnp.int32)
    h0 = jax.random.normal(kh, (1, B, HIDDEN), dtype=jnp.float32)

    out = sent140_rnn_forward(kparams, x_ids, h0)
    out = jax.block_until_ready(out)

    ref = reference_forward(torch_params, x_ids, h0)
    assert out.shape == (B, N_OUT)
    assert bool(jnp.all(jnp.isfinite(out)))
    assert bool(jnp.allclose(out, ref, atol=2e-2, rtol=2e-2))
    print("KERNEL_OK")
</pallas_src>

<mosaic_0001>
module attributes {stable_mosaic.version = 11 : i64} {
  func.func @_sent140_rnn_kernel(%arg0: memref<2x8xi32, #tpu.memory_space<smem>>, %arg1: memref<2x128xf32, #tpu.memory_space<vmem>>, %arg2: memref<1000x128xf32, #tpu.memory_space<any>>, %arg3: memref<128x128xbf16, #tpu.memory_space<vmem>>, %arg4: memref<128x128xbf16, #tpu.memory_space<vmem>>, %arg5: memref<1x128xf32, #tpu.memory_space<vmem>>, %arg6: memref<128x128xbf16, #tpu.memory_space<vmem>>, %arg7: memref<1x128xf32, #tpu.memory_space<vmem>>, %arg8: memref<2x128xf32, #tpu.memory_space<vmem>>, %arg9: memref<2x2x128xf32, #tpu.memory_space<vmem>>, %arg10: memref<2x2x!tpu.dma_semaphore, #tpu.memory_space<semaphore_mem>>) attributes {dimension_semantics = [], scalar_prefetch = 0 : i64, scratch_operands = 2 : i64, tpu.core_type = #tpu.core_type<tc>} {
    %c0 = arith.constant 0 : index
    %c0_0 = arith.constant 0 : index
    %0 = memref.load %arg0[%c0, %c0_0] : memref<2x8xi32, #tpu.memory_space<smem>>
    %c0_i32 = arith.constant 0 : i32
    %c0_i32_1 = arith.constant 0 : i32
    %c0_i32_2 = arith.constant 0 : i32
    %c0_i32_3 = arith.constant 0 : i32
    %1 = tpu.memref_slice %arg2[%0, %c0_i32_3] : memref<1000x128xf32, #tpu.memory_space<any>> -> memref<1x128xf32, #tpu.memory_space<any>>
    %c0_i32_4 = arith.constant 0 : i32
    %c0_i32_5 = arith.constant 0 : i32
    %2 = tpu.memref_slice %arg9[%c0_i32, %c0_i32_4, %c0_i32_5] : memref<2x2x128xf32, #tpu.memory_space<vmem>> -> memref<1x1x128xf32, #tpu.memory_space<vmem>>
    %3 = tpu.memref_squeeze %2 : memref<1x1x128xf32, #tpu.memory_space<vmem>> -> memref<1x128xf32, #tpu.memory_space<vmem>>
    %4 = tpu.memref_slice %arg10[%c0_i32_1, %c0_i32_2] : memref<2x2x!tpu.dma_semaphore, #tpu.memory_space<semaphore_mem>> -> memref<1x1x!tpu.dma_semaphore, #tpu.memory_space<semaphore_mem>>
    %5 = tpu.memref_squeeze %4 : memref<1x1x!tpu.dma_semaphore, #tpu.memory_space<semaphore_mem>> -> memref<!tpu.dma_semaphore, #tpu.memory_space<semaphore_mem>>
    tpu.enqueue_dma source(%1 : memref<1x128xf32, #tpu.memory_space<any>>) target(%3 : memref<1x128xf32, #tpu.memory_space<vmem>>) target_semaphore(%5 : memref<!tpu.dma_semaphore, #tpu.memory_space<semaphore_mem>>)
    %c1 = arith.constant 1 : index
    %c0_6 = arith.constant 0 : index
    %6 = memref.load %arg0[%c1, %c0_6] : memref<2x8xi32, #tpu.memory_space<smem>>
    %c0_i32_7 = arith.constant 0 : i32
    %c0_i32_8 = arith.constant 0 : i32
    %c1_i32 = arith.constant 1 : i32
    %c0_i32_9 = arith.constant 0 : i32
    %7 = tpu.memref_slice %arg2[%6, %c0_i32_9] : memref<1000x128xf32, #tpu.memory_space<any>> -> memref<1x128xf32, #tpu.memory_space<any>>
    %c1_i32_10 = arith.constant 1 : i32
    %c0_i32_11 = arith.constant 0 : i32
    %8 = tpu.memref_slice %arg9[%c0_i32_7, %c1_i32_10, %c0_i32_11] : memref<2x2x128xf32, #tpu.memory_space<vmem>> -> memref<1x1x128xf32, #tpu.memory_space<vmem>>
    %9 = tpu.memref_squeeze %8 : memref<1x1x128xf32, #tpu.memory_space<vmem>> -> memref<1x128xf32, #tpu.memory_space<vmem>>
    %10 = tpu.memref_slice %arg10[%c0_i32_8, %c1_i32] : memref<2x2x!tpu.dma_semaphore, #tpu.memory_space<semaphore_mem>> -> memref<1x1x!tpu.dma_semaphore, #tpu.memory_space<semaphore_mem>>
    %11 = tpu.memref_squeeze %10 : memref<1x1x!tpu.dma_semaphore, #tpu.memory_space<semaphore_mem>> -> memref<!tpu.dma_semaphore, #tpu.memory_space<semaphore_mem>>
    tpu.enqueue_dma source(%7 : memref<1x128xf32, #tpu.memory_space<any>>) target(%9 : memref<1x128xf32, #tpu.memory_space<vmem>>) target_semaphore(%11 : memref<!tpu.dma_semaphore, #tpu.memory_space<semaphore_mem>>)
    %c0_12 = arith.constant 0 : index
    %c0_13 = arith.constant 0 : index
    %12 = vector.load %arg3[%c0_12, %c0_13] : memref<128x128xbf16, #tpu.memory_space<vmem>>, vector<128x128xbf16>
    %c0_14 = arith.constant 0 : index
    %c0_15 = arith.constant 0 : index
    %13 = vector.load %arg4[%c0_14, %c0_15] : memref<128x128xbf16, #tpu.memory_space<vmem>>, vector<128x128xbf16>
    %c0_16 = arith.constant 0 : index
    %c0_17 = arith.constant 0 : index
    %14 = vector.load %arg5[%c0_16, %c0_17] : memref<1x128xf32, #tpu.memory_space<vmem>>, vector<1x128xf32>
    %c0_18 = arith.constant 0 : index
    %c0_19 = arith.constant 0 : index
    %15 = vector.load %arg1[%c0_18, %c0_19] : memref<2x128xf32, #tpu.memory_space<vmem>>, vector<2x128xf32>
    %c0_20 = arith.constant 0 : index
    %c1_21 = arith.constant 1 : index
    %16 = memref.load %arg0[%c0_20, %c1_21] : memref<2x8xi32, #tpu.memory_space<smem>>
    %c1_i32_22 = arith.constant 1 : i32
    %c1_i32_23 = arith.constant 1 : i32
    %c0_i32_24 = arith.constant 0 : i32
    %c0_i32_25 = arith.constant 0 : i32
    %17 = tpu.memref_slice %arg2[%16, %c0_i32_25] : memref<1000x128xf32, #tpu.memory_space<any>> -> memref<1x128xf32, #tpu.memory_space<any>>
    %c0_i32_26 = arith.constant 0 : i32
    %c0_i32_27 = arith.constant 0 : i32
    %18 = tpu.memref_slice %arg9[%c1_i32_22, %c0_i32_26, %c0_i32_27] : memref<2x2x128xf32, #tpu.memory_space<vmem>> -> memref<1x1x128xf32, #tpu.memory_space<vmem>>
    %19 = tpu.memref_squeeze %18 : memref<1x1x128xf32, #tpu.memory_space<vmem>> -> memref<1x128xf32, #tpu.memory_space<vmem>>
    %20 = tpu.memref_slice %arg10[%c1_i32_23, %c0_i32_24] : memref<2x2x!tpu.dma_semaphore, #tpu.memory_space<semaphore_mem>> -> memref<1x1x!tpu.dma_semaphore, #tpu.memory_space<semaphore_mem>>
    %21 = tpu.memref_squeeze %20 : memref<1x1x!tpu.dma_semaphore, #tpu.memory_space<semaphore_mem>> -> memref<!tpu.dma_semaphore, #tpu.memory_space<semaphore_mem>>
    tpu.enqueue_dma source(%17 : memref<1x128xf32, #tpu.memory_space<any>>) target(%19 : memref<1x128xf32, #tpu.memory_space<vmem>>) target_semaphore(%21 : memref<!tpu.dma_semaphore, #tpu.memory_space<semaphore_mem>>)
    %c1_28 = arith.constant 1 : index
    %c1_29 = arith.constant 1 : index
    %22 = memref.load %arg0[%c1_28, %c1_29] : memref<2x8xi32, #tpu.memory_space<smem>>
    %c1_i32_30 = arith.constant 1 : i32
    %c1_i32_31 = arith.constant 1 : i32
    %c1_i32_32 = arith.constant 1 : i32
    %c0_i32_33 = arith.constant 0 : i32
    %23 = tpu.memref_slice %arg2[%22, %c0_i32_33] : memref<1000x128xf32, #tpu.memory_space<any>> -> memref<1x128xf32, #tpu.memory_space<any>>
    %c1_i32_34 = arith.constant 1 : i32
    %c0_i32_35 = arith.constant 0 : i32
    %24 = tpu.memref_slice %arg9[%c1_i32_30, %c1_i32_34, %c0_i32_35] : memref<2x2x128xf32, #tpu.memory_space<vmem>> -> memref<1x1x128xf32, #tpu.memory_space<vmem>>
    %25 = tpu.memref_squeeze %24 : memref<1x1x128xf32, #tpu.memory_space<vmem>> -> memref<1x128xf32, #tpu.memory_space<vmem>>
    %26 = tpu.memref_slice %arg10[%c1_i32_31, %c1_i32_32] : memref<2x2x!tpu.dma_semaphore, #tpu.memory_space<semaphore_mem>> -> memref<1x1x!tpu.dma_semaphore, #tpu.memory_space<semaphore_mem>>
    %27 = tpu.memref_squeeze %26 : memref<1x1x!tpu.dma_semaphore, #tpu.memory_space<semaphore_mem>> -> memref<!tpu.dma_semaphore, #tpu.memory_space<semaphore_mem>>
    tpu.enqueue_dma source(%23 : memref<1x128xf32, #tpu.memory_space<any>>) target(%25 : memref<1x128xf32, #tpu.memory_space<vmem>>) target_semaphore(%27 : memref<!tpu.dma_semaphore, #tpu.memory_space<semaphore_mem>>)
    %c0_i32_36 = arith.constant 0 : i32
    %c0_i32_37 = arith.constant 0 : i32
    %c0_i32_38 = arith.constant 0 : i32
    %c0_i32_39 = arith.constant 0 : i32
    %c0_i32_40 = arith.constant 0 : i32
    %28 = tpu.memref_slice %arg2[%c0_i32_39, %c0_i32_40] : memref<1000x128xf32, #tpu.memory_space<any>> -> memref<1x128xf32, #tpu.memory_space<any>>
    %c0_i32_41 = arith.constant 0 : i32
    %c0_i32_42 = arith.constant 0 : i32
    %29 = tpu.memref_slice %arg9[%c0_i32_36, %c0_i32_41, %c0_i32_42] : memref<2x2x128xf32, #tpu.memory_space<vmem>> -> memref<1x1x128xf32, #tpu.memory_space<vmem>>
    %30 = tpu.memref_squeeze %29 : memref<1x1x128xf32, #tpu.memory_space<vmem>> -> memref<1x128xf32, #tpu.memory_space<vmem>>
    %31 = tpu.memref_slice %arg10[%c0_i32_37, %c0_i32_38] : memref<2x2x!tpu.dma_semaphore, #tpu.memory_space<semaphore_mem>> -> memref<1x1x!tpu.dma_semaphore, #tpu.memory_space<semaphore_mem>>
    %32 = tpu.memref_squeeze %31 : memref<1x1x!tpu.dma_semaphore, #tpu.memory_space<semaphore_mem>> -> memref<!tpu.dma_semaphore, #tpu.memory_space<semaphore_mem>>
    tpu.wait_dma2 semaphore(%32 : memref<!tpu.dma_semaphore, #tpu.memory_space<semaphore_mem>>) src(%28 : memref<1x128xf32, #tpu.memory_space<any>>) dst(%30 : memref<1x128xf32, #tpu.memory_space<vmem>>)
    %c0_i32_43 = arith.constant 0 : i32
    %c0_i32_44 = arith.constant 0 : i32
    %c1_i32_45 = arith.constant 1 : i32
    %c0_i32_46 = arith.constant 0 : i32
    %c0_i32_47 = arith.constant 0 : i32
    %33 = tpu.memref_slice %arg2[%c0_i32_46, %c0_i32_47] : memref<1000x128xf32, #tpu.memory_space<any>> -> memref<1x128xf32, #tpu.memory_space<any>>
    %c1_i32_48 = arith.constant 1 : i32
    %c0_i32_49 = arith.constant 0 : i32
    %34 = tpu.memref_slice %arg9[%c0_i32_43, %c1_i32_48, %c0_i32_49] : memref<2x2x128xf32, #tpu.memory_space<vmem>> -> memref<1x1x128xf32, #tpu.memory_space<vmem>>
    %35 = tpu.memref_squeeze %34 : memref<1x1x128xf32, #tpu.memory_space<vmem>> -> memref<1x128xf32, #tpu.memory_space<vmem>>
    %36 = tpu.memref_slice %arg10[%c0_i32_44, %c1_i32_45] : memref<2x2x!tpu.dma_semaphore, #tpu.memory_space<semaphore_mem>> -> memref<1x1x!tpu.dma_semaphore, #tpu.memory_space<semaphore_mem>>
    %37 = tpu.memref_squeeze %36 : memref<1x1x!tpu.dma_semaphore, #tpu.memory_space<semaphore_mem>> -> memref<!tpu.dma_semaphore, #tpu.memory_space<semaphore_mem>>
    tpu.wait_dma2 semaphore(%37 : memref<!tpu.dma_semaphore, #tpu.memory_space<semaphore_mem>>) src(%33 : memref<1x128xf32, #tpu.memory_space<any>>) dst(%35 : memref<1x128xf32, #tpu.memory_space<vmem>>)
    %c0_50 = arith.constant 0 : index
    %c0_51 = arith.constant 0 : index
    %c0_52 = arith.constant 0 : index
    %38 = vector.load %arg9[%c0_50, %c0_51, %c0_52] : memref<2x2x128xf32, #tpu.memory_space<vmem>>, vector<1x2x128xf32>
    %39 = vector.shape_cast %38 : vector<1x2x128xf32> to vector<2x128xf32>
    %40 = arith.truncf %39 : vector<2x128xf32> to vector<2x128xbf16>
    %cst = arith.constant dense<0.000000e+00> : vector<2x128xf32>
    %41 = tpu.matmul %40, %12, %cst {dimension_numbers = #tpu.dot_dimension_numbers<[1], [0], [0], [1], [0, 0, 1, 1], [], []>} : vector<2x128xbf16>, vector<128x128xbf16>, vector<2x128xf32> -> vector<2x128xf32>
    %42 = arith.truncf %15 : vector<2x128xf32> to vector<2x128xbf16>
    %cst_53 = arith.constant dense<0.000000e+00> : vector<2x128xf32>
    %43 = tpu.matmul %42, %13, %cst_53 {dimension_numbers = #tpu.dot_dimension_numbers<[1], [0], [0], [1], [0, 0, 1, 1], [], []>} : vector<2x128xbf16>, vector<128x128xbf16>, vector<2x128xf32> -> vector<2x128xf32>
    %44 = arith.addf %41, %43 : vector<2x128xf32>
    %45 = vector.broadcast %14 : vector<1x128xf32> to vector<2x128xf32>
    %46 = arith.addf %44, %45 : vector<2x128xf32>
    %47 = math.tanh %46 : vector<2x128xf32>
    %c0_54 = arith.constant 0 : index
    %c2 = arith.constant 2 : index
    %48 = memref.load %arg0[%c0_54, %c2] : memref<2x8xi32, #tpu.memory_space<smem>>
    %c0_i32_55 = arith.constant 0 : i32
    %c0_i32_56 = arith.constant 0 : i32
    %c0_i32_57 = arith.constant 0 : i32
    %c0_i32_58 = arith.constant 0 : i32
    %49 = tpu.memref_slice %arg2[%48, %c0_i32_58] : memref<1000x128xf32, #tpu.memory_space<any>> -> memref<1x128xf32, #tpu.memory_space<any>>
    %c0_i32_59 = arith.constant 0 : i32
    %c0_i32_60 = arith.constant 0 : i32
    %50 = tpu.memref_slice %arg9[%c0_i32_55, %c0_i32_59, %c0_i32_60] : memref<2x2x128xf32, #tpu.memory_space<vmem>> -> memref<1x1x128xf32, #tpu.memory_space<vmem>>
    %51 = tpu.memref_squeeze %50 : memref<1x1x128xf32, #tpu.memory_space<vmem>> -> memref<1x128xf32, #tpu.memory_space<vmem>>
    %52 = tpu.memref_slice %arg10[%c0_i32_56, %c0_i32_57] : memref<2x2x!tpu.dma_semaphore, #tpu.memory_space<semaphore_mem>> -> memref<1x1x!tpu.dma_semaphore, #tpu.memory_space<semaphore_mem>>
    %53 = tpu.memref_squeeze %52 : memref<1x1x!tpu.dma_semaphore, #tpu.memory_space<semaphore_mem>> -> memref<!tpu.dma_semaphore, #tpu.memory_space<semaphore_mem>>
    tpu.enqueue_dma source(%49 : memref<1x128xf32, #tpu.memory_space<any>>) target(%51 : memref<1x128xf32, #tpu.memory_space<vmem>>) target_semaphore(%53 : memref<!tpu.dma_semaphore, #tpu.memory_space<semaphore_mem>>)
    %c1_61 = arith.constant 1 : index
    %c2_62 = arith.constant 2 : index
    %54 = memref.load %arg0[%c1_61, %c2_62] : memref<2x8xi32, #tpu.memory_space<smem>>
    %c0_i32_63 = arith.constant 0 : i32
    %c0_i32_64 = arith.constant 0 : i32
    %c1_i32_65 = arith.constant 1 : i32
    %c0_i32_66 = arith.constant 0 : i32
    %55 = tpu.memref_slice %arg2[%54, %c0_i32_66] : memref<1000x128xf32, #tpu.memory_space<any>> -> memref<1x128xf32, #tpu.memory_space<any>>
    %c1_i32_67 = arith.constant 1 : i32
    %c0_i32_68 = arith.constant 0 : i32
    %56 = tpu.memref_slice %arg9[%c0_i32_63, %c1_i32_67, %c0_i32_68] : memref<2x2x128xf32, #tpu.memory_space<vmem>> -> memref<1x1x128xf32, #tpu.memory_space<vmem>>
    %57 = tpu.memref_squeeze %56 : memref<1x1x128xf32, #tpu.memory_space<vmem>> -> memref<1x128xf32, #tpu.memory_space<vmem>>
    %58 = tpu.memref_slice %arg10[%c0_i32_64, %c1_i32_65] : memref<2x2x!tpu.dma_semaphore, #tpu.memory_space<semaphore_mem>> -> memref<1x1x!tpu.dma_semaphore, #tpu.memory_space<semaphore_mem>>
    %59 = tpu.memref_squeeze %58 : memref<1x1x!tpu.dma_semaphore, #tpu.memory_space<semaphore_mem>> -> memref<!tpu.dma_semaphore, #tpu.memory_space<semaphore_mem>>
    tpu.enqueue_dma source(%55 : memref<1x128xf32, #tpu.memory_space<any>>) target(%57 : memref<1x128xf32, #tpu.memory_space<vmem>>) target_semaphore(%59 : memref<!tpu.dma_semaphore, #tpu.memory_space<semaphore_mem>>)
    %c1_i32_69 = arith.constant 1 : i32
    %c1_i32_70 = arith.constant 1 : i32
    %c0_i32_71 = arith.constant 0 : i32
    %c0_i32_72 = arith.constant 0 : i32
    %c0_i32_73 = arith.constant 0 : i32
    %60 = tpu.memref_slice %arg2[%c0_i32_72, %c0_i32_73] : memref<1000x128xf32, #tpu.memory_space<any>> -> memref<1x128xf32, #tpu.memory_space<any>>
    %c0_i32_74 = arith.constant 0 : i32
    %c0_i32_75 = arith.constant 0 : i32
    %61 = tpu.memref_slice %arg9[%c1_i32_69, %c0_i32_74, %c0_i32_75] : memref<2x2x128xf32, #tpu.memory_space<vmem>> -> memref<1x1x128xf32, #tpu.memory_space<vmem>>
    %62 = tpu.memref_squeeze %61 : memref<1x1x128xf32, #tpu.memory_space<vmem>> -> memref<1x128xf32, #tpu.memory_space<vmem>>
    %63 = tpu.memref_slice %arg10[%c1_i32_70, %c0_i32_71] : memref<2x2x!tpu.dma_semaphore, #tpu.memory_space<semaphore_mem>> -> memref<1x1x!tpu.dma_semaphore, #tpu.memory_space<semaphore_mem>>
    %64 = tpu.memref_squeeze %63 : memref<1x1x!tpu.dma_semaphore, #tpu.memory_space<semaphore_mem>> -> memref<!tpu.dma_semaphore, #tpu.memory_space<semaphore_mem>>
    tpu.wait_dma2 semaphore(%64 : memref<!tpu.dma_semaphore, #tpu.memory_space<semaphore_mem>>) src(%60 : memref<1x128xf32, #tpu.memory_space<any>>) dst(%62 : memref<1x128xf32, #tpu.memory_space<vmem>>)
    %c1_i32_76 = arith.constant 1 : i32
    %c1_i32_77 = arith.constant 1 : i32
    %c1_i32_78 = arith.constant 1 : i32
    %c0_i32_79 = arith.constant 0 : i32
    %c0_i32_80 = arith.constant 0 : i32
    %65 = tpu.memref_slice %arg2[%c0_i32_79, %c0_i32_80] : memref<1000x128xf32, #tpu.memory_space<any>> -> memref<1x128xf32, #tpu.memory_space<any>>
    %c1_i32_81 = arith.constant 1 : i32
    %c0_i32_82 = arith.constant 0 : i32
    %66 = tpu.memref_slice %arg9[%c1_i32_76, %c1_i32_81, %c0_i32_82] : memref<2x2x128xf32, #tpu.memory_space<vmem>> -> memref<1x1x128xf32, #tpu.memory_space<vmem>>
    %67 = tpu.memref_squeeze %66 : memref<1x1x128xf32, #tpu.memory_space<vmem>> -> memref<1x128xf32, #tpu.memory_space<vmem>>
    %68 = tpu.memref_slice %arg10[%c1_i32_77, %c1_i32_78] : memref<2x2x!tpu.dma_semaphore, #tpu.memory_space<semaphore_mem>> -> memref<1x1x!tpu.dma_semaphore, #tpu.memory_space<semaphore_mem>>
    %69 = tpu.memref_squeeze %68 : memref<1x1x!tpu.dma_semaphore, #tpu.memory_space<semaphore_mem>> -> memref<!tpu.dma_semaphore, #tpu.memory_space<semaphore_mem>>
    tpu.wait_dma2 semaphore(%69 : memref<!tpu.dma_semaphore, #tpu.memory_space<semaphore_mem>>) src(%65 : memref<1x128xf32, #tpu.memory_space<any>>) dst(%67 : memref<1x128xf32, #tpu.memory_space<vmem>>)
    %c1_83 = arith.constant 1 : index
    %c0_84 = arith.constant 0 : index
    %c0_85 = arith.constant 0 : index
    %70 = vector.load %arg9[%c1_83, %c0_84, %c0_85] : memref<2x2x128xf32, #tpu.memory_space<vmem>>, vector<1x2x128xf32>
    %71 = vector.shape_cast %70 : vector<1x2x128xf32> to vector<2x128xf32>
    %72 = arith.truncf %71 : vector<2x128xf32> to vector<2x128xbf16>
    %cst_86 = arith.constant dense<0.000000e+00> : vector<2x128xf32>
    %73 = tpu.matmul %72, %12, %cst_86 {dimension_numbers = #tpu.dot_dimension_numbers<[1], [0], [0], [1], [0, 0, 1, 1], [], []>} : vector<2x128xbf16>, vector<128x128xbf16>, vector<2x128xf32> -> vector<2x128xf32>
    %74 = arith.truncf %47 : vector<2x128xf32> to vector<2x128xbf16>
    %cst_87 = arith.constant dense<0.000000e+00> : vector<2x128xf32>
    %75 = tpu.matmul %74, %13, %cst_87 {dimension_numbers = #tpu.dot_dimension_numbers<[1], [0], [0], [1], [0, 0, 1, 1], [], []>} : vector<2x128xbf16>, vector<128x128xbf16>, vector<2x128xf32> -> vector<2x128xf32>
    %76 = arith.addf %73, %75 : vector<2x128xf32>
    %77 = vector.broadcast %14 : vector<1x128xf32> to vector<2x128xf32>
    %78 = arith.addf %76, %77 : vector<2x128xf32>
    %79 = math.tanh %78 : vector<2x128xf32>
    %c0_88 = arith.constant 0 : index
    %c3 = arith.constant 3 : index
    %80 = memref.load %arg0[%c0_88, %c3] : memref<2x8xi32, #tpu.memory_space<smem>>
    %c1_i32_89 = arith.constant 1 : i32
    %c1_i32_90 = arith.constant 1 : i32
    %c0_i32_91 = arith.constant 0 : i32
    %c0_i32_92 = arith.constant 0 : i32
    %81 = tpu.memref_slice %arg2[%80, %c0_i32_92] : memref<1000x128xf32, #tpu.memory_space<any>> -> memref<1x128xf32, #tpu.memory_space<any>>
    %c0_i32_93 = arith.constant 0 : i32
    %c0_i32_94 = arith.constant 0 : i32
    %82 = tpu.memref_slice %arg9[%c1_i32_89, %c0_i32_93, %c0_i32_94] : memref<2x2x128xf32, #tpu.memory_space<vmem>> -> memref<1x1x128xf32, #tpu.memory_space<vmem>>
    %83 = tpu.memref_squeeze %82 : memref<1x1x128xf32, #tpu.memory_space<vmem>> -> memref<1x128xf32, #tpu.memory_space<vmem>>
    %84 = tpu.memref_slice %arg10[%c1_i32_90, %c0_i32_91] : memref<2x2x!tpu.dma_semaphore, #tpu.memory_space<semaphore_mem>> -> memref<1x1x!tpu.dma_semaphore, #tpu.memory_space<semaphore_mem>>
    %85 = tpu.memref_squeeze %84 : memref<1x1x!tpu.dma_semaphore, #tpu.memory_space<semaphore_mem>> -> memref<!tpu.dma_semaphore, #tpu.memory_space<semaphore_mem>>
    tpu.enqueue_dma source(%81 : memref<1x128xf32, #tpu.memory_space<any>>) target(%83 : memref<1x128xf32, #tpu.memory_space<vmem>>) target_semaphore(%85 : memref<!tpu.dma_semaphore, #tpu.memory_space<semaphore_mem>>)
    %c1_95 = arith.constant 1 : index
    %c3_96 = arith.constant 3 : index
    %86 = memref.load %arg0[%c1_95, %c3_96] : memref<2x8xi32, #tpu.memory_space<smem>>
    %c1_i32_97 = arith.constant 1 : i32
    %c1_i32_98 = arith.constant 1 : i32
    %c1_i32_99 = arith.constant 1 : i32
    %c0_i32_100 = arith.constant 0 : i32
    %87 = tpu.memref_slice %arg2[%86, %c0_i32_100] : memref<1000x128xf32, #tpu.memory_space<any>> -> memref<1x128xf32, #tpu.memory_space<any>>
    %c1_i32_101 = arith.constant 1 : i32
    %c0_i32_102 = arith.constant 0 : i32
    %88 = tpu.memref_slice %arg9[%c1_i32_97, %c1_i32_101, %c0_i32_102] : memref<2x2x128xf32, #tpu.memory_space<vmem>> -> memref<1x1x128xf32, #tpu.memory_space<vmem>>
    %89 = tpu.memref_squeeze %88 : memref<1x1x128xf32, #tpu.memory_space<vmem>> -> memref<1x128xf32, #tpu.memory_space<vmem>>
    %90 = tpu.memref_slice %arg10[%c1_i32_98, %c1_i32_99] : memref<2x2x!tpu.dma_semaphore, #tpu.memory_space<semaphore_mem>> -> memref<1x1x!tpu.dma_semaphore, #tpu.memory_space<semaphore_mem>>
    %91 = tpu.memref_squeeze %90 : memref<1x1x!tpu.dma_semaphore, #tpu.memory_space<semaphore_mem>> -> memref<!tpu.dma_semaphore, #tpu.memory_space<semaphore_mem>>
    tpu.enqueue_dma source(%87 : memref<1x128xf32, #tpu.memory_space<any>>) target(%89 : memref<1x128xf32, #tpu.memory_space<vmem>>) target_semaphore(%91 : memref<!tpu.dma_semaphore, #tpu.memory_space<semaphore_mem>>)
    %c0_i32_103 = arith.constant 0 : i32
    %c0_i32_104 = arith.constant 0 : i32
    %c0_i32_105 = arith.constant 0 : i32
    %c0_i32_106 = arith.constant 0 : i32
    %c0_i32_107 = arith.constant 0 : i32
    %92 = tpu.memref_slice %arg2[%c0_i32_106, %c0_i32_107] : memref<1000x128xf32, #tpu.memory_space<any>> -> memref<1x128xf32, #tpu.memory_space<any>>
    %c0_i32_108 = arith.constant 0 : i32
    %c0_i32_109 = arith.constant 0 : i32
    %93 = tpu.memref_slice %arg9[%c0_i32_103, %c0_i32_108, %c0_i32_109] : memref<2x2x128xf32, #tpu.memory_space<vmem>> -> memref<1x1x128xf32, #tpu.memory_space<vmem>>
    %94 = tpu.memref_squeeze %93 : memref<1x1x128xf32, #tpu.memory_space<vmem>> -> memref<1x128xf32, #tpu.memory_space<vmem>>
    %95 = tpu.memref_slice %arg10[%c0_i32_104, %c0_i32_105] : memref<2x2x!tpu.dma_semaphore, #tpu.memory_space<semaphore_mem>> -> memref<1x1x!tpu.dma_semaphore, #tpu.memory_space<semaphore_mem>>
    %96 = tpu.memref_squeeze %95 : memref<1x1x!tpu.dma_semaphore, #tpu.memory_space<semaphore_mem>> -> memref<!tpu.dma_semaphore, #tpu.memory_space<semaphore_mem>>
    tpu.wait_dma2 semaphore(%96 : memref<!tpu.dma_semaphore, #tpu.memory_space<semaphore_mem>>) src(%92 : memref<1x128xf32, #tpu.memory_space<any>>) dst(%94 : memref<1x128xf32, #tpu.memory_space<vmem>>)
    %c0_i32_110 = arith.constant 0 : i32
    %c0_i32_111 = arith.constant 0 : i32
    %c1_i32_112 = arith.constant 1 : i32
    %c0_i32_113 = arith.constant 0 : i32
    %c0_i32_114 = arith.constant 0 : i32
    %97 = tpu.memref_slice %arg2[%c0_i32_113, %c0_i32_114] : memref<1000x128xf32, #tpu.memory_space<any>> -> memref<1x128xf32, #tpu.memory_space<any>>
    %c1_i32_115 = arith.constant 1 : i32
    %c0_i32_116 = arith.constant 0 : i32
    %98 = tpu.memref_slice %arg9[%c0_i32_110, %c1_i32_115, %c0_i32_116] : memref<2x2x128xf32, #tpu.memory_space<vmem>> -> memref<1x1x128xf32, #tpu.memory_space<vmem>>
    %99 = tpu.memref_squeeze %98 : memref<1x1x128xf32, #tpu.memory_space<vmem>> -> memref<1x128xf32, #tpu.memory_space<vmem>>
    %100 = tpu.memref_slice %arg10[%c0_i32_111, %c1_i32_112] : memref<2x2x!tpu.dma_semaphore, #tpu.memory_space<semaphore_mem>> -> memref<1x1x!tpu.dma_semaphore, #tpu.memory_space<semaphore_mem>>
    %101 = tpu.memref_squeeze %100 : memref<1x1x!tpu.dma_semaphore, #tpu.memory_space<semaphore_mem>> -> memref<!tpu.dma_semaphore, #tpu.memory_space<semaphore_mem>>
    tpu.wait_dma2 semaphore(%101 : memref<!tpu.dma_semaphore, #tpu.memory_space<semaphore_mem>>) src(%97 : memref<1x128xf32, #tpu.memory_space<any>>) dst(%99 : memref<1x128xf32, #tpu.memory_space<vmem>>)
    %c0_117 = arith.constant 0 : index
    %c0_118 = arith.constant 0 : index
    %c0_119 = arith.constant 0 : index
    %102 = vector.load %arg9[%c0_117, %c0_118, %c0_119] : memref<2x2x128xf32, #tpu.memory_space<vmem>>, vector<1x2x128xf32>
    %103 = vector.shape_cast %102 : vector<1x2x128xf32> to vector<2x128xf32>
    %104 = arith.truncf %103 : vector<2x128xf32> to vector<2x128xbf16>
    %cst_120 = arith.constant dense<0.000000e+00> : vector<2x128xf32>
    %105 = tpu.matmul %104, %12, %cst_120 {dimension_numbers = #tpu.dot_dimension_numbers<[1], [0], [0], [1], [0, 0, 1, 1], [], []>} : vector<2x128xbf16>, vector<128x128xbf16>, vector<2x128xf32> -> vector<2x128xf32>
    %106 = arith.truncf %79 : vector<2x128xf32> to vector<2x128xbf16>
    %cst_121 = arith.constant dense<0.000000e+00> : vector<2x128xf32>
    %107 = tpu.matmul %106, %13, %cst_121 {dimension_numbers = #tpu.dot_dimension_numbers<[1], [0], [0], [1], [0, 0, 1, 1], [], []>} : vector<2x128xbf16>, vector<128x128xbf16>, vector<2x128xf32> -> vector<2x128xf32>
    %108 = arith.addf %105, %107 : vector<2x128xf32>
    %109 = vector.broadcast %14 : vector<1x128xf32> to vector<2x128xf32>
    %110 = arith.addf %108, %109 : vector<2x128xf32>
    %111 = math.tanh %110 : vector<2x128xf32>
    %c0_122 = arith.constant 0 : index
    %c4 = arith.constant 4 : index
    %112 = memref.load %arg0[%c0_122, %c4] : memref<2x8xi32, #tpu.memory_space<smem>>
    %c0_i32_123 = arith.constant 0 : i32
    %c0_i32_124 = arith.constant 0 : i32
    %c0_i32_125 = arith.constant 0 : i32
    %c0_i32_126 = arith.constant 0 : i32
    %113 = tpu.memref_slice %arg2[%112, %c0_i32_126] : memref<1000x128xf32, #tpu.memory_space<any>> -> memref<1x128xf32, #tpu.memory_space<any>>
    %c0_i32_127 = arith.constant 0 : i32
    %c0_i32_128 = arith.constant 0 : i32
    %114 = tpu.memref_slice %arg9[%c0_i32_123, %c0_i32_127, %c0_i32_128] : memref<2x2x128xf32, #tpu.memory_space<vmem>> -> memref<1x1x128xf32, #tpu.memory_space<vmem>>
    %115 = tpu.memref_squeeze %114 : memref<1x1x128xf32, #tpu.memory_space<vmem>> -> memref<1x128xf32, #tpu.memory_space<vmem>>
    %116 = tpu.memref_slice %arg10[%c0_i32_124, %c0_i32_125] : memref<2x2x!tpu.dma_semaphore, #tpu.memory_space<semaphore_mem>> -> memref<1x1x!tpu.dma_semaphore, #tpu.memory_space<semaphore_mem>>
    %117 = tpu.memref_squeeze %116 : memref<1x1x!tpu.dma_semaphore, #tpu.memory_space<semaphore_mem>> -> memref<!tpu.dma_semaphore, #tpu.memory_space<semaphore_mem>>
    tpu.enqueue_dma source(%113 : memref<1x128xf32, #tpu.memory_space<any>>) target(%115 : memref<1x128xf32, #tpu.memory_space<vmem>>) target_semaphore(%117 : memref<!tpu.dma_semaphore, #tpu.memory_space<semaphore_mem>>)
    %c1_129 = arith.constant 1 : index
    %c4_130 = arith.constant 4 : index
    %118 = memref.load %arg0[%c1_129, %c4_130] : memref<2x8xi32, #tpu.memory_space<smem>>
    %c0_i32_131 = arith.constant 0 : i32
    %c0_i32_132 = arith.constant 0 : i32
    %c1_i32_133 = arith.constant 1 : i32
    %c0_i32_134 = arith.constant 0 : i32
    %119 = tpu.memref_slice %arg2[%118, %c0_i32_134] : memref<1000x128xf32, #tpu.memory_space<any>> -> memref<1x128xf32, #tpu.memory_space<any>>
    %c1_i32_135 = arith.constant 1 : i32
    %c0_i32_136 = arith.constant 0 : i32
    %120 = tpu.memref_slice %arg9[%c0_i32_131, %c1_i32_135, %c0_i32_136] : memref<2x2x128xf32, #tpu.memory_space<vmem>> -> memref<1x1x128xf32, #tpu.memory_space<vmem>>
    %121 = tpu.memref_squeeze %120 : memref<1x1x128xf32, #tpu.memory_space<vmem>> -> memref<1x128xf32, #tpu.memory_space<vmem>>
    %122 = tpu.memref_slice %arg10[%c0_i32_132, %c1_i32_133] : memref<2x2x!tpu.dma_semaphore, #tpu.memory_space<semaphore_mem>> -> memref<1x1x!tpu.dma_semaphore, #tpu.memory_space<semaphore_mem>>
    %123 = tpu.memref_squeeze %122 : memref<1x1x!tpu.dma_semaphore, #tpu.memory_space<semaphore_mem>> -> memref<!tpu.dma_semaphore, #tpu.memory_space<semaphore_mem>>
    tpu.enqueue_dma source(%119 : memref<1x128xf32, #tpu.memory_space<any>>) target(%121 : memref<1x128xf32, #tpu.memory_space<vmem>>) target_semaphore(%123 : memref<!tpu.dma_semaphore, #tpu.memory_space<semaphore_mem>>)
    %c1_i32_137 = arith.constant 1 : i32
    %c1_i32_138 = arith.constant 1 : i32
    %c0_i32_139 = arith.constant 0 : i32
    %c0_i32_140 = arith.constant 0 : i32
    %c0_i32_141 = arith.constant 0 : i32
    %124 = tpu.memref_slice %arg2[%c0_i32_140, %c0_i32_141] : memref<1000x128xf32, #tpu.memory_space<any>> -> memref<1x128xf32, #tpu.memory_space<any>>
    %c0_i32_142 = arith.constant 0 : i32
    %c0_i32_143 = arith.constant 0 : i32
    %125 = tpu.memref_slice %arg9[%c1_i32_137, %c0_i32_142, %c0_i32_143] : memref<2x2x128xf32, #tpu.memory_space<vmem>> -> memref<1x1x128xf32, #tpu.memory_space<vmem>>
    %126 = tpu.memref_squeeze %125 : memref<1x1x128xf32, #tpu.memory_space<vmem>> -> memref<1x128xf32, #tpu.memory_space<vmem>>
    %127 = tpu.memref_slice %arg10[%c1_i32_138, %c0_i32_139] : memref<2x2x!tpu.dma_semaphore, #tpu.memory_space<semaphore_mem>> -> memref<1x1x!tpu.dma_semaphore, #tpu.memory_space<semaphore_mem>>
    %128 = tpu.memref_squeeze %127 : memref<1x1x!tpu.dma_semaphore, #tpu.memory_space<semaphore_mem>> -> memref<!tpu.dma_semaphore, #tpu.memory_space<semaphore_mem>>
    tpu.wait_dma2 semaphore(%128 : memref<!tpu.dma_semaphore, #tpu.memory_space<semaphore_mem>>) src(%124 : memref<1x128xf32, #tpu.memory_space<any>>) dst(%126 : memref<1x128xf32, #tpu.memory_space<vmem>>)
    %c1_i32_144 = arith.constant 1 : i32
    %c1_i32_145 = arith.constant 1 : i32
    %c1_i32_146 = arith.constant 1 : i32
    %c0_i32_147 = arith.constant 0 : i32
    %c0_i32_148 = arith.constant 0 : i32
    %129 = tpu.memref_slice %arg2[%c0_i32_147, %c0_i32_148] : memref<1000x128xf32, #tpu.memory_space<any>> -> memref<1x128xf32, #tpu.memory_space<any>>
    %c1_i32_149 = arith.constant 1 : i32
    %c0_i32_150 = arith.constant 0 : i32
    %130 = tpu.memref_slice %arg9[%c1_i32_144, %c1_i32_149, %c0_i32_150] : memref<2x2x128xf32, #tpu.memory_space<vmem>> -> memref<1x1x128xf32, #tpu.memory_space<vmem>>
    %131 = tpu.memref_squeeze %130 : memref<1x1x128xf32, #tpu.memory_space<vmem>> -> memref<1x128xf32, #tpu.memory_space<vmem>>
    %132 = tpu.memref_slice %arg10[%c1_i32_145, %c1_i32_146] : memref<2x2x!tpu.dma_semaphore, #tpu.memory_space<semaphore_mem>> -> memref<1x1x!tpu.dma_semaphore, #tpu.memory_space<semaphore_mem>>
    %133 = tpu.memref_squeeze %132 : memref<1x1x!tpu.dma_semaphore, #tpu.memory_space<semaphore_mem>> -> memref<!tpu.dma_semaphore, #tpu.memory_space<semaphore_mem>>
    tpu.wait_dma2 semaphore(%133 : memref<!tpu.dma_semaphore, #tpu.memory_space<semaphore_mem>>) src(%129 : memref<1x128xf32, #tpu.memory_space<any>>) dst(%131 : memref<1x128xf32, #tpu.memory_space<vmem>>)
    %c1_151 = arith.constant 1 : index
    %c0_152 = arith.constant 0 : index
    %c0_153 = arith.constant 0 : index
    %134 = vector.load %arg9[%c1_151, %c0_152, %c0_153] : memref<2x2x128xf32, #tpu.memory_space<vmem>>, vector<1x2x128xf32>
    %135 = vector.shape_cast %134 : vector<1x2x128xf32> to vector<2x128xf32>
    %136 = arith.truncf %135 : vector<2x128xf32> to vector<2x128xbf16>
    %cst_154 = arith.constant dense<0.000000e+00> : vector<2x128xf32>
    %137 = tpu.matmul %136, %12, %cst_154 {dimension_numbers = #tpu.dot_dimension_numbers<[1], [0], [0], [1], [0, 0, 1, 1], [], []>} : vector<2x128xbf16>, vector<128x128xbf16>, vector<2x128xf32> -> vector<2x128xf32>
    %138 = arith.truncf %111 : vector<2x128xf32> to vector<2x128xbf16>
    %cst_155 = arith.constant dense<0.000000e+00> : vector<2x128xf32>
    %139 = tpu.matmul %138, %13, %cst_155 {dimension_numbers = #tpu.dot_dimension_numbers<[1], [0], [0], [1], [0, 0, 1, 1], [], []>} : vector<2x128xbf16>, vector<128x128xbf16>, vector<2x128xf32> -> vector<2x128xf32>
    %140 = arith.addf %137, %139 : vector<2x128xf32>
    %141 = vector.broadcast %14 : vector<1x128xf32> to vector<2x128xf32>
    %142 = arith.addf %140, %141 : vector<2x128xf32>
    %143 = math.tanh %142 : vector<2x128xf32>
    %c0_156 = arith.constant 0 : index
    %c5 = arith.constant 5 : index
    %144 = memref.load %arg0[%c0_156, %c5] : memref<2x8xi32, #tpu.memory_space<smem>>
    %c1_i32_157 = arith.constant 1 : i32
    %c1_i32_158 = arith.constant 1 : i32
    %c0_i32_159 = arith.constant 0 : i32
    %c0_i32_160 = arith.constant 0 : i32
    %145 = tpu.memref_slice %arg2[%144, %c0_i32_160] : memref<1000x128xf32, #tpu.memory_space<any>> -> memref<1x128xf32, #tpu.memory_space<any>>
    %c0_i32_161 = arith.constant 0 : i32
    %c0_i32_162 = arith.constant 0 : i32
    %146 = tpu.memref_slice %arg9[%c1_i32_157, %c0_i32_161, %c0_i32_162] : memref<2x2x128xf32, #tpu.memory_space<vmem>> -> memref<1x1x128xf32, #tpu.memory_space<vmem>>
    %147 = tpu.memref_squeeze %146 : memref<1x1x128xf32, #tpu.memory_space<vmem>> -> memref<1x128xf32, #tpu.memory_space<vmem>>
    %148 = tpu.memref_slice %arg10[%c1_i32_158, %c0_i32_159] : memref<2x2x!tpu.dma_semaphore, #tpu.memory_space<semaphore_mem>> -> memref<1x1x!tpu.dma_semaphore, #tpu.memory_space<semaphore_mem>>
    %149 = tpu.memref_squeeze %148 : memref<1x1x!tpu.dma_semaphore, #tpu.memory_space<semaphore_mem>> -> memref<!tpu.dma_semaphore, #tpu.memory_space<semaphore_mem>>
    tpu.enqueue_dma source(%145 : memref<1x128xf32, #tpu.memory_space<any>>) target(%147 : memref<1x128xf32, #tpu.memory_space<vmem>>) target_semaphore(%149 : memref<!tpu.dma_semaphore, #tpu.memory_space<semaphore_mem>>)
    %c1_163 = arith.constant 1 : index
    %c5_164 = arith.constant 5 : index
    %150 = memref.load %arg0[%c1_163, %c5_164] : memref<2x8xi32, #tpu.memory_space<smem>>
    %c1_i32_165 = arith.constant 1 : i32
    %c1_i32_166 = arith.constant 1 : i32
    %c1_i32_167 = arith.constant 1 : i32
    %c0_i32_168 = arith.constant 0 : i32
    %151 = tpu.memref_slice %arg2[%150, %c0_i32_168] : memref<1000x128xf32, #tpu.memory_space<any>> -> memref<1x128xf32, #tpu.memory_space<any>>
    %c1_i32_169 = arith.constant 1 : i32
    %c0_i32_170 = arith.constant 0 : i32
    %152 = tpu.memref_slice %arg9[%c1_i32_165, %c1_i32_169, %c0_i32_170] : memref<2x2x128xf32, #tpu.memory_space<vmem>> -> memref<1x1x128xf32, #tpu.memory_space<vmem>>
    %153 = tpu.memref_squeeze %152 : memref<1x1x128xf32, #tpu.memory_space<vmem>> -> memref<1x128xf32, #tpu.memory_space<vmem>>
    %154 = tpu.memref_slice %arg10[%c1_i32_166, %c1_i32_167] : memref<2x2x!tpu.dma_semaphore, #tpu.memory_space<semaphore_mem>> -> memref<1x1x!tpu.dma_semaphore, #tpu.memory_space<semaphore_mem>>
    %155 = tpu.memref_squeeze %154 : memref<1x1x!tpu.dma_semaphore, #tpu.memory_space<semaphore_mem>> -> memref<!tpu.dma_semaphore, #tpu.memory_space<semaphore_mem>>
    tpu.enqueue_dma source(%151 : memref<1x128xf32, #tpu.memory_space<any>>) target(%153 : memref<1x128xf32, #tpu.memory_space<vmem>>) target_semaphore(%155 : memref<!tpu.dma_semaphore, #tpu.memory_space<semaphore_mem>>)
    %c0_i32_171 = arith.constant 0 : i32
    %c0_i32_172 = arith.constant 0 : i32
    %c0_i32_173 = arith.constant 0 : i32
    %c0_i32_174 = arith.constant 0 : i32
    %c0_i32_175 = arith.constant 0 : i32
    %156 = tpu.memref_slice %arg2[%c0_i32_174, %c0_i32_175] : memref<1000x128xf32, #tpu.memory_space<any>> -> memref<1x128xf32, #tpu.memory_space<any>>
    %c0_i32_176 = arith.constant 0 : i32
    %c0_i32_177 = arith.constant 0 : i32
    %157 = tpu.memref_slice %arg9[%c0_i32_171, %c0_i32_176, %c0_i32_177] : memref<2x2x128xf32, #tpu.memory_space<vmem>> -> memref<1x1x128xf32, #tpu.memory_space<vmem>>
    %158 = tpu.memref_squeeze %157 : memref<1x1x128xf32, #tpu.memory_space<vmem>> -> memref<1x128xf32, #tpu.memory_space<vmem>>
    %159 = tpu.memref_slice %arg10[%c0_i32_172, %c0_i32_173] : memref<2x2x!tpu.dma_semaphore, #tpu.memory_space<semaphore_mem>> -> memref<1x1x!tpu.dma_semaphore, #tpu.memory_space<semaphore_mem>>
    %160 = tpu.memref_squeeze %159 : memref<1x1x!tpu.dma_semaphore, #tpu.memory_space<semaphore_mem>> -> memref<!tpu.dma_semaphore, #tpu.memory_space<semaphore_mem>>
    tpu.wait_dma2 semaphore(%160 : memref<!tpu.dma_semaphore, #tpu.memory_space<semaphore_mem>>) src(%156 : memref<1x128xf32, #tpu.memory_space<any>>) dst(%158 : memref<1x128xf32, #tpu.memory_space<vmem>>)
    %c0_i32_178 = arith.constant 0 : i32
    %c0_i32_179 = arith.constant 0 : i32
    %c1_i32_180 = arith.constant 1 : i32
    %c0_i32_181 = arith.constant 0 : i32
    %c0_i32_182 = arith.constant 0 : i32
    %161 = tpu.memref_slice %arg2[%c0_i32_181, %c0_i32_182] : memref<1000x128xf32, #tpu.memory_space<any>> -> memref<1x128xf32, #tpu.memory_space<any>>
    %c1_i32_183 = arith.constant 1 : i32
    %c0_i32_184 = arith.constant 0 : i32
    %162 = tpu.memref_slice %arg9[%c0_i32_178, %c1_i32_183, %c0_i32_184] : memref<2x2x128xf32, #tpu.memory_space<vmem>> -> memref<1x1x128xf32, #tpu.memory_space<vmem>>
    %163 = tpu.memref_squeeze %162 : memref<1x1x128xf32, #tpu.memory_space<vmem>> -> memref<1x128xf32, #tpu.memory_space<vmem>>
    %164 = tpu.memref_slice %arg10[%c0_i32_179, %c1_i32_180] : memref<2x2x!tpu.dma_semaphore, #tpu.memory_space<semaphore_mem>> -> memref<1x1x!tpu.dma_semaphore, #tpu.memory_space<semaphore_mem>>
    %165 = tpu.memref_squeeze %164 : memref<1x1x!tpu.dma_semaphore, #tpu.memory_space<semaphore_mem>> -> memref<!tpu.dma_semaphore, #tpu.memory_space<semaphore_mem>>
    tpu.wait_dma2 semaphore(%165 : memref<!tpu.dma_semaphore, #tpu.memory_space<semaphore_mem>>) src(%161 : memref<1x128xf32, #tpu.memory_space<any>>) dst(%163 : memref<1x128xf32, #tpu.memory_space<vmem>>)
    %c0_185 = arith.constant 0 : index
    %c0_186 = arith.constant 0 : index
    %c0_187 = arith.constant 0 : index
    %166 = vector.load %arg9[%c0_185, %c0_186, %c0_187] : memref<2x2x128xf32, #tpu.memory_space<vmem>>, vector<1x2x128xf32>
    %167 = vector.shape_cast %166 : vector<1x2x128xf32> to vector<2x128xf32>
    %168 = arith.truncf %167 : vector<2x128xf32> to vector<2x128xbf16>
    %cst_188 = arith.constant dense<0.000000e+00> : vector<2x128xf32>
    %169 = tpu.matmul %168, %12, %cst_188 {dimension_numbers = #tpu.dot_dimension_numbers<[1], [0], [0], [1], [0, 0, 1, 1], [], []>} : vector<2x128xbf16>, vector<128x128xbf16>, vector<2x128xf32> -> vector<2x128xf32>
    %170 = arith.truncf %143 : vector<2x128xf32> to vector<2x128xbf16>
    %cst_189 = arith.constant dense<0.000000e+00> : vector<2x128xf32>
    %171 = tpu.matmul %170, %13, %cst_189 {dimension_numbers = #tpu.dot_dimension_numbers<[1], [0], [0], [1], [0, 0, 1, 1], [], []>} : vector<2x128xbf16>, vector<128x128xbf16>, vector<2x128xf32> -> vector<2x128xf32>
    %172 = arith.addf %169, %171 : vector<2x128xf32>
    %173 = vector.broadcast %14 : vector<1x128xf32> to vector<2x128xf32>
    %174 = arith.addf %172, %173 : vector<2x128xf32>
    %175 = math.tanh %174 : vector<2x128xf32>
    %c0_190 = arith.constant 0 : index
    %c6 = arith.constant 6 : index
    %176 = memref.load %arg0[%c0_190, %c6] : memref<2x8xi32, #tpu.memory_space<smem>>
    %c0_i32_191 = arith.constant 0 : i32
    %c0_i32_192 = arith.constant 0 : i32
    %c0_i32_193 = arith.constant 0 : i32
    %c0_i32_194 = arith.constant 0 : i32
    %177 = tpu.memref_slice %arg2[%176, %c0_i32_194] : memref<1000x128xf32, #tpu.memory_space<any>> -> memref<1x128xf32, #tpu.memory_space<any>>
    %c0_i32_195 = arith.constant 0 : i32
    %c0_i32_196 = arith.constant 0 : i32
    %178 = tpu.memref_slice %arg9[%c0_i32_191, %c0_i32_195, %c0_i32_196] : memref<2x2x128xf32, #tpu.memory_space<vmem>> -> memref<1x1x128xf32, #tpu.memory_space<vmem>>
    %179 = tpu.memref_squeeze %178 : memref<1x1x128xf32, #tpu.memory_space<vmem>> -> memref<1x128xf32, #tpu.memory_space<vmem>>
    %180 = tpu.memref_slice %arg10[%c0_i32_192, %c0_i32_193] : memref<2x2x!tpu.dma_semaphore, #tpu.memory_space<semaphore_mem>> -> memref<1x1x!tpu.dma_semaphore, #tpu.memory_space<semaphore_mem>>
    %181 = tpu.memref_squeeze %180 : memref<1x1x!tpu.dma_semaphore, #tpu.memory_space<semaphore_mem>> -> memref<!tpu.dma_semaphore, #tpu.memory_space<semaphore_mem>>
    tpu.enqueue_dma source(%177 : memref<1x128xf32, #tpu.memory_space<any>>) target(%179 : memref<1x128xf32, #tpu.memory_space<vmem>>) target_semaphore(%181 : memref<!tpu.dma_semaphore, #tpu.memory_space<semaphore_mem>>)
    %c1_197 = arith.constant 1 : index
    %c6_198 = arith.constant 6 : index
    %182 = memref.load %arg0[%c1_197, %c6_198] : memref<2x8xi32, #tpu.memory_space<smem>>
    %c0_i32_199 = arith.constant 0 : i32
    %c0_i32_200 = arith.constant 0 : i32
    %c1_i32_201 = arith.constant 1 : i32
    %c0_i32_202 = arith.constant 0 : i32
    %183 = tpu.memref_slice %arg2[%182, %c0_i32_202] : memref<1000x128xf32, #tpu.memory_space<any>> -> memref<1x128xf32, #tpu.memory_space<any>>
    %c1_i32_203 = arith.constant 1 : i32
    %c0_i32_204 = arith.constant 0 : i32
    %184 = tpu.memref_slice %arg9[%c0_i32_199, %c1_i32_203, %c0_i32_204] : memref<2x2x128xf32, #tpu.memory_space<vmem>> -> memref<1x1x128xf32, #tpu.memory_space<vmem>>
    %185 = tpu.memref_squeeze %184 : memref<1x1x128xf32, #tpu.memory_space<vmem>> -> memref<1x128xf32, #tpu.memory_space<vmem>>
    %186 = tpu.memref_slice %arg10[%c0_i32_200, %c1_i32_201] : memref<2x2x!tpu.dma_semaphore, #tpu.memory_space<semaphore_mem>> -> memref<1x1x!tpu.dma_semaphore, #tpu.memory_space<semaphore_mem>>
    %187 = tpu.memref_squeeze %186 : memref<1x1x!tpu.dma_semaphore, #tpu.memory_space<semaphore_mem>> -> memref<!tpu.dma_semaphore, #tpu.memory_space<semaphore_mem>>
    tpu.enqueue_dma source(%183 : memref<1x128xf32, #tpu.memory_space<any>>) target(%185 : memref<1x128xf32, #tpu.memory_space<vmem>>) target_semaphore(%187 : memref<!tpu.dma_semaphore, #tpu.memory_space<semaphore_mem>>)
    %c1_i32_205 = arith.constant 1 : i32
    %c1_i32_206 = arith.constant 1 : i32
    %c0_i32_207 = arith.constant 0 : i32
    %c0_i32_208 = arith.constant 0 : i32
    %c0_i32_209 = arith.constant 0 : i32
    %188 = tpu.memref_slice %arg2[%c0_i32_208, %c0_i32_209] : memref<1000x128xf32, #tpu.memory_space<any>> -> memref<1x128xf32, #tpu.memory_space<any>>
    %c0_i32_210 = arith.constant 0 : i32
    %c0_i32_211 = arith.constant 0 : i32
    %189 = tpu.memref_slice %arg9[%c1_i32_205, %c0_i32_210, %c0_i32_211] : memref<2x2x128xf32, #tpu.memory_space<vmem>> -> memref<1x1x128xf32, #tpu.memory_space<vmem>>
    %190 = tpu.memref_squeeze %189 : memref<1x1x128xf32, #tpu.memory_space<vmem>> -> memref<1x128xf32, #tpu.memory_space<vmem>>
    %191 = tpu.memref_slice %arg10[%c1_i32_206, %c0_i32_207] : memref<2x2x!tpu.dma_semaphore, #tpu.memory_space<semaphore_mem>> -> memref<1x1x!tpu.dma_semaphore, #tpu.memory_space<semaphore_mem>>
    %192 = tpu.memref_squeeze %191 : memref<1x1x!tpu.dma_semaphore, #tpu.memory_space<semaphore_mem>> -> memref<!tpu.dma_semaphore, #tpu.memory_space<semaphore_mem>>
    tpu.wait_dma2 semaphore(%192 : memref<!tpu.dma_semaphore, #tpu.memory_space<semaphore_mem>>) src(%188 : memref<1x128xf32, #tpu.memory_space<any>>) dst(%190 : memref<1x128xf32, #tpu.memory_space<vmem>>)
    %c1_i32_212 = arith.constant 1 : i32
    %c1_i32_213 = arith.constant 1 : i32
    %c1_i32_214 = arith.constant 1 : i32
    %c0_i32_215 = arith.constant 0 : i32
    %c0_i32_216 = arith.constant 0 : i32
    %193 = tpu.memref_slice %arg2[%c0_i32_215, %c0_i32_216] : memref<1000x128xf32, #tpu.memory_space<any>> -> memref<1x128xf32, #tpu.memory_space<any>>
    %c1_i32_217 = arith.constant 1 : i32
    %c0_i32_218 = arith.constant 0 : i32
    %194 = tpu.memref_slice %arg9[%c1_i32_212, %c1_i32_217, %c0_i32_218] : memref<2x2x128xf32, #tpu.memory_space<vmem>> -> memref<1x1x128xf32, #tpu.memory_space<vmem>>
    %195 = tpu.memref_squeeze %194 : memref<1x1x128xf32, #tpu.memory_space<vmem>> -> memref<1x128xf32, #tpu.memory_space<vmem>>
    %196 = tpu.memref_slice %arg10[%c1_i32_213, %c1_i32_214] : memref<2x2x!tpu.dma_semaphore, #tpu.memory_space<semaphore_mem>> -> memref<1x1x!tpu.dma_semaphore, #tpu.memory_space<semaphore_mem>>
    %197 = tpu.memref_squeeze %196 : memref<1x1x!tpu.dma_semaphore, #tpu.memory_space<semaphore_mem>> -> memref<!tpu.dma_semaphore, #tpu.memory_space<semaphore_mem>>
    tpu.wait_dma2 semaphore(%197 : memref<!tpu.dma_semaphore, #tpu.memory_space<semaphore_mem>>) src(%193 : memref<1x128xf32, #tpu.memory_space<any>>) dst(%195 : memref<1x128xf32, #tpu.memory_space<vmem>>)
    %c1_219 = arith.constant 1 : index
    %c0_220 = arith.constant 0 : index
    %c0_221 = arith.constant 0 : index
    %198 = vector.load %arg9[%c1_219, %c0_220, %c0_221] : memref<2x2x128xf32, #tpu.memory_space<vmem>>, vector<1x2x128xf32>
    %199 = vector.shape_cast %198 : vector<1x2x128xf32> to vector<2x128xf32>
    %200 = arith.truncf %199 : vector<2x128xf32> to vector<2x128xbf16>
    %cst_222 = arith.constant dense<0.000000e+00> : vector<2x128xf32>
    %201 = tpu.matmul %200, %12, %cst_222 {dimension_numbers = #tpu.dot_dimension_numbers<[1], [0], [0], [1], [0, 0, 1, 1], [], []>} : vector<2x128xbf16>, vector<128x128xbf16>, vector<2x128xf32> -> vector<2x128xf32>
    %202 = arith.truncf %175 : vector<2x128xf32> to vector<2x128xbf16>
    %cst_223 = arith.constant dense<0.000000e+00> : vector<2x128xf32>
    %203 = tpu.matmul %202, %13, %cst_223 {dimension_numbers = #tpu.dot_dimension_numbers<[1], [0], [0], [1], [0, 0, 1, 1], [], []>} : vector<2x128xbf16>, vector<128x128xbf16>, vector<2x128xf32> -> vector<2x128xf32>
    %204 = arith.addf %201, %203 : vector<2x128xf32>
    %205 = vector.broadcast %14 : vector<1x128xf32> to vector<2x128xf32>
    %206 = arith.addf %204, %205 : vector<2x128xf32>
    %207 = math.tanh %206 : vector<2x128xf32>
    %c0_224 = arith.constant 0 : index
    %c7 = arith.constant 7 : index
    %208 = memref.load %arg0[%c0_224, %c7] : memref<2x8xi32, #tpu.memory_space<smem>>
    %c1_i32_225 = arith.constant 1 : i32
    %c1_i32_226 = arith.constant 1 : i32
    %c0_i32_227 = arith.constant 0 : i32
    %c0_i32_228 = arith.constant 0 : i32
    %209 = tpu.memref_slice %arg2[%208, %c0_i32_228] : memref<1000x128xf32, #tpu.memory_space<any>> -> memref<1x128xf32, #tpu.memory_space<any>>
    %c0_i32_229 = arith.constant 0 : i32
    %c0_i32_230 = arith.constant 0 : i32
    %210 = tpu.memref_slice %arg9[%c1_i32_225, %c0_i32_229, %c0_i32_230] : memref<2x2x128xf32, #tpu.memory_space<vmem>> -> memref<1x1x128xf32, #tpu.memory_space<vmem>>
    %211 = tpu.memref_squeeze %210 : memref<1x1x128xf32, #tpu.memory_space<vmem>> -> memref<1x128xf32, #tpu.memory_space<vmem>>
    %212 = tpu.memref_slice %arg10[%c1_i32_226, %c0_i32_227] : memref<2x2x!tpu.dma_semaphore, #tpu.memory_space<semaphore_mem>> -> memref<1x1x!tpu.dma_semaphore, #tpu.memory_space<semaphore_mem>>
    %213 = tpu.memref_squeeze %212 : memref<1x1x!tpu.dma_semaphore, #tpu.memory_space<semaphore_mem>> -> memref<!tpu.dma_semaphore, #tpu.memory_space<semaphore_mem>>
    tpu.enqueue_dma source(%209 : memref<1x128xf32, #tpu.memory_space<any>>) target(%211 : memref<1x128xf32, #tpu.memory_space<vmem>>) target_semaphore(%213 : memref<!tpu.dma_semaphore, #tpu.memory_space<semaphore_mem>>)
    %c1_231 = arith.constant 1 : index
    %c7_232 = arith.constant 7 : index
    %214 = memref.load %arg0[%c1_231, %c7_232] : memref<2x8xi32, #tpu.memory_space<smem>>
    %c1_i32_233 = arith.constant 1 : i32
    %c1_i32_234 = arith.constant 1 : i32
    %c1_i32_235 = arith.constant 1 : i32
    %c0_i32_236 = arith.constant 0 : i32
    %215 = tpu.memref_slice %arg2[%214, %c0_i32_236] : memref<1000x128xf32, #tpu.memory_space<any>> -> memref<1x128xf32, #tpu.memory_space<any>>
    %c1_i32_237 = arith.constant 1 : i32
    %c0_i32_238 = arith.constant 0 : i32
    %216 = tpu.memref_slice %arg9[%c1_i32_233, %c1_i32_237, %c0_i32_238] : memref<2x2x128xf32, #tpu.memory_space<vmem>> -> memref<1x1x128xf32, #tpu.memory_space<vmem>>
    %217 = tpu.memref_squeeze %216 : memref<1x1x128xf32, #tpu.memory_space<vmem>> -> memref<1x128xf32, #tpu.memory_space<vmem>>
    %218 = tpu.memref_slice %arg10[%c1_i32_234, %c1_i32_235] : memref<2x2x!tpu.dma_semaphore, #tpu.memory_space<semaphore_mem>> -> memref<1x1x!tpu.dma_semaphore, #tpu.memory_space<semaphore_mem>>
    %219 = tpu.memref_squeeze %218 : memref<1x1x!tpu.dma_semaphore, #tpu.memory_space<semaphore_mem>> -> memref<!tpu.dma_semaphore, #tpu.memory_space<semaphore_mem>>
    tpu.enqueue_dma source(%215 : memref<1x128xf32, #tpu.memory_space<any>>) target(%217 : memref<1x128xf32, #tpu.memory_space<vmem>>) target_semaphore(%219 : memref<!tpu.dma_semaphore, #tpu.memory_space<semaphore_mem>>)
    %c0_i32_239 = arith.constant 0 : i32
    %c0_i32_240 = arith.constant 0 : i32
    %c0_i32_241 = arith.constant 0 : i32
    %c0_i32_242 = arith.constant 0 : i32
    %c0_i32_243 = arith.constant 0 : i32
    %220 = tpu.memref_slice %arg2[%c0_i32_242, %c0_i32_243] : memref<1000x128xf32, #tpu.memory_space<any>> -> memref<1x128xf32, #tpu.memory_space<any>>
    %c0_i32_244 = arith.constant 0 : i32
    %c0_i32_245 = arith.constant 0 : i32
    %221 = tpu.memref_slice %arg9[%c0_i32_239, %c0_i32_244, %c0_i32_245] : memref<2x2x128xf32, #tpu.memory_space<vmem>> -> memref<1x1x128xf32, #tpu.memory_space<vmem>>
    %222 = tpu.memref_squeeze %221 : memref<1x1x128xf32, #tpu.memory_space<vmem>> -> memref<1x128xf32, #tpu.memory_space<vmem>>
    %223 = tpu.memref_slice %arg10[%c0_i32_240, %c0_i32_241] : memref<2x2x!tpu.dma_semaphore, #tpu.memory_space<semaphore_mem>> -> memref<1x1x!tpu.dma_semaphore, #tpu.memory_space<semaphore_mem>>
    %224 = tpu.memref_squeeze %223 : memref<1x1x!tpu.dma_semaphore, #tpu.memory_space<semaphore_mem>> -> memref<!tpu.dma_semaphore, #tpu.memory_space<semaphore_mem>>
    tpu.wait_dma2 semaphore(%224 : memref<!tpu.dma_semaphore, #tpu.memory_space<semaphore_mem>>) src(%220 : memref<1x128xf32, #tpu.memory_space<any>>) dst(%222 : memref<1x128xf32, #tpu.memory_space<vmem>>)
    %c0_i32_246 = arith.constant 0 : i32
    %c0_i32_247 = arith.constant 0 : i32
    %c1_i32_248 = arith.constant 1 : i32
    %c0_i32_249 = arith.constant 0 : i32
    %c0_i32_250 = arith.constant 0 : i32
    %225 = tpu.memref_slice %arg2[%c0_i32_249, %c0_i32_250] : memref<1000x128xf32, #tpu.memory_space<any>> -> memref<1x128xf32, #tpu.memory_space<any>>
    %c1_i32_251 = arith.constant 1 : i32
    %c0_i32_252 = arith.constant 0 : i32
    %226 = tpu.memref_slice %arg9[%c0_i32_246, %c1_i32_251, %c0_i32_252] : memref<2x2x128xf32, #tpu.memory_space<vmem>> -> memref<1x1x128xf32, #tpu.memory_space<vmem>>
    %227 = tpu.memref_squeeze %226 : memref<1x1x128xf32, #tpu.memory_space<vmem>> -> memref<1x128xf32, #tpu.memory_space<vmem>>
    %228 = tpu.memref_slice %arg10[%c0_i32_247, %c1_i32_248] : memref<2x2x!tpu.dma_semaphore, #tpu.memory_space<semaphore_mem>> -> memref<1x1x!tpu.dma_semaphore, #tpu.memory_space<semaphore_mem>>
    %229 = tpu.memref_squeeze %228 : memref<1x1x!tpu.dma_semaphore, #tpu.memory_space<semaphore_mem>> -> memref<!tpu.dma_semaphore, #tpu.memory_space<semaphore_mem>>
    tpu.wait_dma2 semaphore(%229 : memref<!tpu.dma_semaphore, #tpu.memory_space<semaphore_mem>>) src(%225 : memref<1x128xf32, #tpu.memory_space<any>>) dst(%227 : memref<1x128xf32, #tpu.memory_space<vmem>>)
    %c0_253 = arith.constant 0 : index
    %c0_254 = arith.constant 0 : index
    %c0_255 = arith.constant 0 : index
    %230 = vector.load %arg9[%c0_253, %c0_254, %c0_255] : memref<2x2x128xf32, #tpu.memory_space<vmem>>, vector<1x2x128xf32>
    %231 = vector.shape_cast %230 : vector<1x2x128xf32> to vector<2x128xf32>
    %232 = arith.truncf %231 : vector<2x128xf32> to vector<2x128xbf16>
    %cst_256 = arith.constant dense<0.000000e+00> : vector<2x128xf32>
    %233 = tpu.matmul %232, %12, %cst_256 {dimension_numbers = #tpu.dot_dimension_numbers<[1], [0], [0], [1], [0, 0, 1, 1], [], []>} : vector<2x128xbf16>, vector<128x128xbf16>, vector<2x128xf32> -> vector<2x128xf32>
    %234 = arith.truncf %207 : vector<2x128xf32> to vector<2x128xbf16>
    %cst_257 = arith.constant dense<0.000000e+00> : vector<2x128xf32>
    %235 = tpu.matmul %234, %13, %cst_257 {dimension_numbers = #tpu.dot_dimension_numbers<[1], [0], [0], [1], [0, 0, 1, 1], [], []>} : vector<2x128xbf16>, vector<128x128xbf16>, vector<2x128xf32> -> vector<2x128xf32>
    %236 = arith.addf %233, %235 : vector<2x128xf32>
    %237 = vector.broadcast %14 : vector<1x128xf32> to vector<2x128xf32>
    %238 = arith.addf %236, %237 : vector<2x128xf32>
    %239 = math.tanh %238 : vector<2x128xf32>
    %c1_i32_258 = arith.constant 1 : i32
    %c1_i32_259 = arith.constant 1 : i32
    %c0_i32_260 = arith.constant 0 : i32
    %c0_i32_261 = arith.constant 0 : i32
    %c0_i32_262 = arith.constant 0 : i32
    %240 = tpu.memref_slice %arg2[%c0_i32_261, %c0_i32_262] : memref<1000x128xf32, #tpu.memory_space<any>> -> memref<1x128xf32, #tpu.memory_space<any>>
    %c0_i32_263 = arith.constant 0 : i32
    %c0_i32_264 = arith.constant 0 : i32
    %241 = tpu.memref_slice %arg9[%c1_i32_258, %c0_i32_263, %c0_i32_264] : memref<2x2x128xf32, #tpu.memory_space<vmem>> -> memref<1x1x128xf32, #tpu.memory_space<vmem>>
    %242 = tpu.memref_squeeze %241 : memref<1x1x128xf32, #tpu.memory_space<vmem>> -> memref<1x128xf32, #tpu.memory_space<vmem>>
    %243 = tpu.memref_slice %arg10[%c1_i32_259, %c0_i32_260] : memref<2x2x!tpu.dma_semaphore, #tpu.memory_space<semaphore_mem>> -> memref<1x1x!tpu.dma_semaphore, #tpu.memory_space<semaphore_mem>>
    %244 = tpu.memref_squeeze %243 : memref<1x1x!tpu.dma_semaphore, #tpu.memory_space<semaphore_mem>> -> memref<!tpu.dma_semaphore, #tpu.memory_space<semaphore_mem>>
    tpu.wait_dma2 semaphore(%244 : memref<!tpu.dma_semaphore, #tpu.memory_space<semaphore_mem>>) src(%240 : memref<1x128xf32, #tpu.memory_space<any>>) dst(%242 : memref<1x128xf32, #tpu.memory_space<vmem>>)
    %c1_i32_265 = arith.constant 1 : i32
    %c1_i32_266 = arith.constant 1 : i32
    %c1_i32_267 = arith.constant 1 : i32
    %c0_i32_268 = arith.constant 0 : i32
    %c0_i32_269 = arith.constant 0 : i32
    %245 = tpu.memref_slice %arg2[%c0_i32_268, %c0_i32_269] : memref<1000x128xf32, #tpu.memory_space<any>> -> memref<1x128xf32, #tpu.memory_space<any>>
    %c1_i32_270 = arith.constant 1 : i32
    %c0_i32_271 = arith.constant 0 : i32
    %246 = tpu.memref_slice %arg9[%c1_i32_265, %c1_i32_270, %c0_i32_271] : memref<2x2x128xf32, #tpu.memory_space<vmem>> -> memref<1x1x128xf32, #tpu.memory_space<vmem>>
    %247 = tpu.memref_squeeze %246 : memref<1x1x128xf32, #tpu.memory_space<vmem>> -> memref<1x128xf32, #tpu.memory_space<vmem>>
    %248 = tpu.memref_slice %arg10[%c1_i32_266, %c1_i32_267] : memref<2x2x!tpu.dma_semaphore, #tpu.memory_space<semaphore_mem>> -> memref<1x1x!tpu.dma_semaphore, #tpu.memory_space<semaphore_mem>>
    %249 = tpu.memref_squeeze %248 : memref<1x1x!tpu.dma_semaphore, #tpu.memory_space<semaphore_mem>> -> memref<!tpu.dma_semaphore, #tpu.memory_space<semaphore_mem>>
    tpu.wait_dma2 semaphore(%249 : memref<!tpu.dma_semaphore, #tpu.memory_space<semaphore_mem>>) src(%245 : memref<1x128xf32, #tpu.memory_space<any>>) dst(%247 : memref<1x128xf32, #tpu.memory_space<vmem>>)
    %c1_272 = arith.constant 1 : index
    %c0_273 = arith.constant 0 : index
    %c0_274 = arith.constant 0 : index
    %250 = vector.load %arg9[%c1_272, %c0_273, %c0_274] : memref<2x2x128xf32, #tpu.memory_space<vmem>>, vector<1x2x128xf32>
    %251 = vector.shape_cast %250 : vector<1x2x128xf32> to vector<2x128xf32>
    %252 = arith.truncf %251 : vector<2x128xf32> to vector<2x128xbf16>
    %cst_275 = arith.constant dense<0.000000e+00> : vector<2x128xf32>
    %253 = tpu.matmul %252, %12, %cst_275 {dimension_numbers = #tpu.dot_dimension_numbers<[1], [0], [0], [1], [0, 0, 1, 1], [], []>} : vector<2x128xbf16>, vector<128x128xbf16>, vector<2x128xf32> -> vector<2x128xf32>
    %254 = arith.truncf %239 : vector<2x128xf32> to vector<2x128xbf16>
    %cst_276 = arith.constant dense<0.000000e+00> : vector<2x128xf32>
    %255 = tpu.matmul %254, %13, %cst_276 {dimension_numbers = #tpu.dot_dimension_numbers<[1], [0], [0], [1], [0, 0, 1, 1], [], []>} : vector<2x128xbf16>, vector<128x128xbf16>, vector<2x128xf32> -> vector<2x128xf32>
    %256 = arith.addf %253, %255 : vector<2x128xf32>
    %257 = vector.broadcast %14 : vector<1x128xf32> to vector<2x128xf32>
    %258 = arith.addf %256, %257 : vector<2x128xf32>
    %259 = math.tanh %258 : vector<2x128xf32>
    %260 = arith.truncf %259 : vector<2x128xf32> to vector<2x128xbf16>
    %c0_277 = arith.constant 0 : index
    %c0_278 = arith.constant 0 : index
    %261 = vector.load %arg6[%c0_277, %c0_278] : memref<128x128xbf16, #tpu.memory_space<vmem>>, vector<128x128xbf16>
    %cst_279 = arith.constant dense<0.000000e+00> : vector<2x128xf32>
    %262 = tpu.matmul %260, %261, %cst_279 {dimension_numbers = #tpu.dot_dimension_numbers<[1], [0], [0], [1], [0, 0, 1, 1], [], []>} : vector<2x128xbf16>, vector<128x128xbf16>, vector<2x128xf32> -> vector<2x128xf32>
    %c0_280 = arith.constant 0 : index
    %c0_281 = arith.constant 0 : index
    %263 = vector.load %arg7[%c0_280, %c0_281] : memref<1x128xf32, #tpu.memory_space<vmem>>, vector<1x128xf32>
    %264 = vector.broadcast %263 : vector<1x128xf32> to vector<2x128xf32>
    %265 = arith.addf %262, %264 : vector<2x128xf32>
    %c0_282 = arith.constant 0 : index
    %c0_283 = arith.constant 0 : index
    %266 = vector.load %arg8[%c0_282, %c0_283] : memref<2x128xf32, #tpu.memory_space<vmem>>, vector<2x128xf32>
    tpu.vector_store %arg8[%c0_282, %c0_283], %265 {strides = array<i32>} : memref<2x128xf32, #tpu.memory_space<vmem>>, vector<2x128xf32>,
    return
  }
}

</mosaic_0001>

<bundles_post_ra>
// kernel: sent140_rnn_forward.1
= control target key start
LH: loop header
LB: loop body
LE: loop exit
PB: predicated region body
PF: predicated region fallthrough
CT: control target
= control target key end

     0   :  { %13 = vsyncpa [#allocation7], 0  ;;  %s2147_s0 = inlined_call_operand.vmem [shape: s32[2,8], index: 0, kind: input, shape index: {}]   ;;  %s2148_s1 = inlined_call_operand.vmem [shape: f32[2,128], index: 1, kind: input, shape index: {}]   ;;  %s2149_s2 = inlined_call_operand.hbm [shape: f32[1000,128], index: 2, kind: input, shape index: {}]   ;;  %s2150_s3 = inlined_call_operand.hbm [shape: bf16[128,128], index: 3, kind: input, shape index: {}]   ;;  %s2151_s4 = inlined_call_operand.hbm [shape: bf16[128,128], index: 4, kind: input, shape index: {}]   ;;  %s2152_s5 = inlined_call_operand.hbm [shape: f32[1,128], index: 5, kind: input, shape index: {}]   ;;  %s2153_s6 = inlined_call_operand.hbm [shape: bf16[128,128], index: 6, kind: input, shape index: {}]   ;;  %s2154_s7 = inlined_call_operand.hbm [shape: f32[1,128], index: 7, kind: input, shape index: {}]   ;;  %s2155_s8 = inlined_call_operand.hbm [shape: f32[2,128], index: 8, kind: output, shape index: {}]  }
   0x1   :  { %14 = vsyncpa [#allocation5], 0 }
   0x2   :  { %15 = vsyncpa [#allocation10], 0 }
   0x3   :  { %16 = vsyncpa [#allocation13], 0 }
   0x4   :  { %17 = vsyncpa [#allocation6], 0  ;;  %s46_s29 = sshll.u32 %s2151_s4, 4  ;;  %s1672_s30 = smov [#allocation9]   ;;  %s47_s29 = int_to_ptr.hbm [resolvable:$true] %s46_s29 }
   0x5   :  { %s48_s9 = sshll.u32 %s1672_s30, 4  ;;  %s70_s12 = sshll.u32 %s2153_s6, 4  ;;  %s49_s9 = int_to_ptr.vmem [resolvable:$true] %s48_s9  ;;  %s71_s12 = int_to_ptr.hbm [resolvable:$true] %s70_s12 }
   0x6   :  { %s1673_s13 = smov 64   ;;  %s1674_s14 = smov 4  }
   0x7   :  { %54 = dma.hbm_to_vmem [thread:$0]  %s47_s29, 1024, %s49_s9, [#allocation10], %s1673_s13, %s1673_s13, %s1674_s14  }
   0x8   :  { %s1675_s15 = smov [#allocation12]   ;;  %s23_s19 = sshll.u32 %s2147_s0, 4  ;;  %s24_s19 = int_to_ptr.vmem [resolvable:$true] %s23_s19 }
   0x9   :  { %s72_s16 = sshll.u32 %s1675_s15, 4  ;;  %s33_s21 = sshll.u32 %s2150_s3, 4  ;;  %s73_s16 = int_to_ptr.vmem [resolvable:$true] %s72_s16  ;;  %s34_s21 = int_to_ptr.hbm [resolvable:$true] %s33_s21 }
   0xa   :  { %78 = dma.hbm_to_vmem [thread:$0]  %s71_s12, 1024, %s73_s16, [#allocation13], %s1673_s13, %s1673_s13, %s1674_s14  }
   0xb   :  { %s1676_s22 = smov [#allocation4]   ;;  %s1677_s6 = smov [#allocation8]  }
   0xc   :  { %26 = dma.vmem_to_smem %s24_s19, 32, %s1676_s22, [#allocation7]  }
   0xd   :  { %s35_s23 = sshll.u32 %s1677_s6, 4  ;;  %s60_s26 = sshll.u32 %s2152_s5, 4  ;;  %s36_s23 = int_to_ptr.vmem [resolvable:$true] %s35_s23  ;;  %s61_s26 = int_to_ptr.hbm [resolvable:$true] %s60_s26 }
   0xe   :  { %41 = dma.hbm_to_vmem [thread:$0]  %s34_s21, 1024, %s36_s23, [#allocation5], %s1673_s13, %s1673_s13, %s1674_s14  }
   0xf   :  { %s84_s28 = sshll.u32 %s2154_s7, 4  ;;  %s1678_s29 = smov [#allocation11]   ;;  %s85_s28 = int_to_ptr.hbm [resolvable:$true] %s84_s28 }
  0x10   :  { %s62_s30 = sshll.u32 %s1678_s29, 4  ;;  %s1679_s3 = smov [#allocation14]   ;;  %s63_s30 = int_to_ptr.vmem [resolvable:$true] %s62_s30 }
  0x11   :  { %65 = dma.hbm_to_vmem [thread:$0]  %s61_s26, 16, %s63_s30, [#allocation10]  }
  0x12   :  { %s86_s9 = sshll.u32 %s1679_s3, 4  ;;  %s87_s9 = int_to_ptr.vmem [resolvable:$true] %s86_s9 }
  0x13   :  { %89 = dma.hbm_to_vmem [thread:$0]  %s85_s28, 16, %s87_s9, [#allocation13]  }
  0x14   :  { %1630 = dma.done.wait [#allocation7], 32  }
  0x15   :  { %1631 = vsyncadd [#allocation7], 4294967264 }
  0x16   :  { %1632 = dma.done.wait [#allocation5], 1024  }
  0x17   :  { %1633 = vsyncadd [#allocation5], 4294966272 }
  0x18   :  { %1634 = dma.done.wait [#allocation10], 1040  }
  0x19   :  { %1635 = vsyncadd [#allocation10], 4294966256 }
  0x1a   :  { %1636 = dma.done.wait [#allocation13], 1040  }
  0x1b   :  { %1637 = vsyncadd [#allocation13], 4294966256 }
  0x1c   :  { %114 = sfence }
  0x1d   :  { %s115_s5 = sld [smem:[#allocation4]]  ;;  %v1748_v0 = vld [vmem:[#allocation8] sm:$0xf]  ;;  %v1750_v1 = vld [vmem:[#allocation8] sm:$0xf0]  ;;  %s1680_s10 = smov [#allocation2]  }
  0x1e   :  { %s921_s7 = sld [smem:[#allocation4 + $0x80]]  ;;  %s126_s11 = sshll.u32 %s1680_s10, 4  ;;  %v1752_v2 = vld [vmem:[#allocation8 + $0x8] sm:$0xf]  ;;  %v1754_v3 = vld [vmem:[#allocation8 + $0x8] sm:$0xf0]  ;;  %s1766_s11 = int_to_ptr.vmem [resolvable:$true] %s126_s11 }
  0x1f   :  { %s1681_s12 = smov [#allocation2 + $0x1]   ;;  %v1756_v4 = vld [vmem:[#allocation8 + $0x10] sm:$0xf]  ;;  %v1758_v5 = vld [vmem:[#allocation8 + $0x10] sm:$0xf0]  ;;  %s1801_s24 = scalar_lea.hbm %s2149_s2, 1000 }
  0x20   :  { %s143_s13 = sshll.u32 %s1681_s12, 4  ;;  %v1760_v6 = vld [vmem:[#allocation8 + $0x18] sm:$0xf]  ;;  %v1762_v7 = vld [vmem:[#allocation8 + $0x18] sm:$0xf0]  ;;  %s1777_s13 = int_to_ptr.vmem [resolvable:$true] %s143_s13 }
  0x21   :  { %v1764_v8 = vld [vmem:[#allocation8 + $0x20] sm:$0xf]  ;;  %v1768_v9 = vld [vmem:[#allocation8 + $0x20] sm:$0xf0]  ;;  %v1770_v10 = vld [vmem:[#allocation8 + $0x28] sm:$0xf] }
  0x22   :  { %v1772_v11 = vld [vmem:[#allocation8 + $0x28] sm:$0xf0]  ;;  %v1779_v12 = vld [vmem:[#allocation8 + $0x30] sm:$0xf]  ;;  %v1781_v13 = vld [vmem:[#allocation8 + $0x30] sm:$0xf0] }
  0x23   :  { %s116_s16 = scalar_lea.hbm %s2149_s2, %s115_s5  ;;  %v1783_v14 = vld [vmem:[#allocation8 + $0x38] sm:$0xf]  ;;  %v1788_v15 = vld [vmem:[#allocation8 + $0x38] sm:$0xf0]  ;;  %v1790_v16 = vld [vmem:[#allocation9] sm:$0xf] }
  0x24   :  { %s124_s17 = sshll.u32 %s116_s16, 4  ;;  %s131_s4 = scalar_lea.hbm %s2149_s2, %s921_s7  ;;  %v1794_v17 = vld [vmem:[#allocation9] sm:$0xf0]  ;;  %v1796_v18 = vld [vmem:[#allocation9 + $0x8] sm:$0xf]  ;;  %s125_s17 = int_to_ptr.hbm [resolvable:$true] %s124_s17 }
  0x25   :  { %s1792_s20 = sshll.u32 %s131_s4, 4  ;;  %s1222_s21 = sshra.s32 %s125_s17, 4  ;;  %s1223_s21 = int_to_ptr.hbm [resolvable:$true] %s1222_s21  ;;  %s142_s20 = int_to_ptr.hbm [resolvable:$true] %s1792_s20 }
  0x26   :  { %s1224_s22 = scalar_lea.hbm %s1223_s21, 1  ;;  %p1227_p1 = scmp.lt.s32.totalorder %s1223_s21, %s2149_s2 }
  0x27   :  { %p1225_p0 = scmp.ne.s32.totalorder %s1223_s21, %s1224_s22  ;;  %p1228_p2 = scmp.lt.s32.totalorder %s1801_s24, %s1224_s22 }
  0x29   :  { %p1229_p3 = por %p1228_p2, %p1227_p1 }
  0x2b   :  { %p1230_p4 = pnand %p1229_p3, %p1225_p0 }
  0x2d   :  { %1233 = shalt.err (!%p1230_p4)  }
  0x2e   :  { %129 = dma.hbm_to_vmem [thread:$0]  %s125_s17, 16, %s1766_s11, [#allocation3]  ;;  %v1808_v19 = vld [vmem:[#allocation9 + $0x8] sm:$0xf0]  ;;  %v1810_v20 = vld [vmem:[#allocation9 + $0x10] sm:$0xf] }
  0x2f   :  { %v1813_v21 = vld [vmem:[#allocation9 + $0x10] sm:$0xf0]  ;;  %v1815_v22 = vld [vmem:[#allocation9 + $0x18] sm:$0xf]  ;;  %v1817_v23 = vld [vmem:[#allocation9 + $0x18] sm:$0xf0] }
  0x30   :  { %s1246_s0 = sshra.s32 %s142_s20, 4  ;;  %s1247_s0 = int_to_ptr.hbm [resolvable:$true] %s1246_s0 }
  0x31   :  { %s1248_s27 = scalar_lea.hbm %s1247_s0, 1  ;;  %p1251_p6 = scmp.lt.s32.totalorder %s1247_s0, %s2149_s2 }
  0x32   :  { %p1249_p5 = scmp.ne.s32.totalorder %s1247_s0, %s1248_s27  ;;  %p1252_p7 = scmp.lt.s32.totalorder %s1801_s24, %s1248_s27 }
  0x34   :  { %p1253_p8 = por %p1252_p7, %p1251_p6 }
  0x36   :  { %p1254_p9 = pnand %p1253_p8, %p1249_p5 }
  0x38   :  { %1257 = shalt.err (!%p1254_p9)  }
  0x39   :  { %146 = dma.hbm_to_vmem [thread:$0]  %s142_s20, 16, %s1777_s13, [#allocation3 + $0x1]  ;;  %v942_v24 = vld [vmem:[#allocation9 + $0x20] sm:$0xf]  ;;  %v1048_v25 = vld [vmem:[#allocation9 + $0x20] sm:$0xf0] }
  0x3a   :  { %v946_v26 = vld [vmem:[#allocation9 + $0x28] sm:$0xf]  ;;  %v1049_v27 = vld [vmem:[#allocation9 + $0x28] sm:$0xf0]  ;;  %v950_v28 = vld [vmem:[#allocation9 + $0x30] sm:$0xf] }
  0x3b   :  { %v1050_v29 = vld [vmem:[#allocation9 + $0x30] sm:$0xf0]  ;;  %v954_v30 = vld [vmem:[#allocation9 + $0x38] sm:$0xf]  ;;  %v1051_v31 = vld [vmem:[#allocation9 + $0x38] sm:$0xf0] }
  0x3c   :  { %v1824_v32 = vld [vmem:[#allocation11] sm:$0x1]  ;;  %v1829_v33 = vld [vmem:[%s2148_s1] sm:$0x3]  ;;  %s922_s9 = sld [smem:[#allocation4 + $0x1]]  ;;  %s1682_s7 = smov [#allocation2 + $0x2]  }
  0x3d   :  { %s923_s5 = sld [smem:[#allocation4 + $0x81]]  ;;  %s194_s10 = sshll.u32 %s1682_s7, 4  ;;  %s1831_s10 = int_to_ptr.vmem [resolvable:$true] %s194_s10 }
  0x3e   :  { %s1683_s12 = smov [#allocation2 + $0x3]  }
  0x3f   :  { %s211_s14 = sshll.u32 %s1683_s12, 4  ;;  %s1836_s14 = int_to_ptr.vmem [resolvable:$true] %s211_s14 }
  0x42   :  { %s182_s17 = scalar_lea.hbm %s2149_s2, %s922_s9 }
  0x43   :  { %s192_s18 = sshll.u32 %s182_s17, 4  ;;  %s199_s1 = scalar_lea.hbm %s2149_s2, %s923_s5  ;;  %s193_s18 = int_to_ptr.hbm [resolvable:$true] %s192_s18 }
  0x44   :  { %s209_s20 = sshll.u32 %s199_s1, 4  ;;  %s1270_s21 = sshra.s32 %s193_s18, 4  ;;  %s1271_s21 = int_to_ptr.hbm [resolvable:$true] %s1270_s21  ;;  %s210_s20 = int_to_ptr.hbm [resolvable:$true] %s209_s20 }
  0x45   :  { %s1272_s22 = scalar_lea.hbm %s1271_s21, 1  ;;  %p1275_p11 = scmp.lt.s32.totalorder %s1271_s21, %s2149_s2 }
  0x46   :  { %p1273_p10 = scmp.ne.s32.totalorder %s1271_s21, %s1272_s22  ;;  %p1276_p12 = scmp.lt.s32.totalorder %s1801_s24, %s1272_s22 }
  0x48   :  { %p1277_p13 = por %p1276_p12, %p1275_p11 }
  0x4a   :  { %p1278_p0 = pnand %p1277_p13, %p1273_p10 }
  0x4c   :  { %1281 = shalt.err (!%p1278_p0)  }
  0x4d   :  { %197 = dma.hbm_to_vmem [thread:$0]  %s193_s18, 16, %s1831_s10, [#allocation3 + $0x2] }
  0x4e   :  { %s1294_s25 = sshra.s32 %s210_s20, 4  ;;  %s1295_s25 = int_to_ptr.hbm [resolvable:$true] %s1294_s25 }
  0x4f   :  { %s1296_s26 = scalar_lea.hbm %s1295_s25, 1  ;;  %p1299_p2 = scmp.lt.s32.totalorder %s1295_s25, %s2149_s2 }
  0x50   :  { %p1297_p1 = scmp.ne.s32.totalorder %s1295_s25, %s1296_s26  ;;  %p1300_p3 = scmp.lt.s32.totalorder %s1801_s24, %s1296_s26 }
  0x52   :  { %p1301_p4 = por %p1300_p3, %p1299_p2 }
  0x54   :  { %p1302_p5 = pnand %p1301_p4, %p1297_p1 }
  0x56   :  { %1305 = shalt.err (!%p1302_p5)  }
  0x57   :  { %214 = dma.hbm_to_vmem [thread:$0]  %s210_s20, 16, %s1836_s14, [#allocation3 + $0x3] }
  0x58   :  { %1638 = dma.done.wait [#allocation3], 16 }
  0x59   :  { %1639 = vsyncadd [#allocation3], 4294967280  ;;  %v1851_v34 = vor.u32 %v1051_v31, %v954_v30  ;;  %v1855_v35 = vor.u32 %v1788_v15, %v1783_v14 }
  0x5a   :  { %1640 = dma.done.wait [#allocation3 + $0x1], 16 }
  0x5b   :  { %1641 = vsyncadd [#allocation3 + $0x1], 4294967280  ;;  %271 = vmatpush.bf16.msra.mxu0 %v1851_v34  ;;  %332 = vmatpush.bf16.msra.mxu1 %v1855_v35  ;;  %v1859_v36 = vor.u32 %v1050_v29, %v950_v28  ;;  %v1863_v37 = vor.u32 %v1781_v13, %v1779_v12  ;;  %v1867_v38 = vor.u32 %v1049_v27, %v946_v26  ;;  %v220_v50 = vld [vmem:[#allocation2] sm:$0x3]  ;;  %s988_s28 = sld [smem:[#allocation4 + $0x2]] }
  0x5c   :  { %v1871_v39 = vor.u32 %v1772_v11, %v1770_v10  ;;  %v1875_v40 = vor.u32 %v1048_v25, %v942_v24  ;;  %v1879_v41 = vor.u32 %v1768_v9, %v1764_v8  ;;  %v1885_v42 = vor.u32 %v1817_v23, %v1815_v22  ;;  %s989_s29 = sld [smem:[#allocation4 + $0x82]] }
  0x5d   :  { %v1889_v43 = vor.u32 %v1762_v7, %v1760_v6  ;;  %v1895_v44 = vor.u32 %v1813_v21, %v1810_v20  ;;  %v1899_v45 = vor.u32 %v1758_v5, %v1756_v4  ;;  %v1905_v46 = vor.u32 %v1808_v19, %v1796_v18 }
  0x5e   :  { %v1909_v47 = vor.u32 %v1754_v3, %v1752_v2  ;;  %v1915_v48 = vor.u32 %v1794_v17, %v1790_v16  ;;  %v1919_v49 = vor.u32 %v1750_v1, %v1748_v0  ;;  %v222_v51 = vpack.c.bf16 %v1829_v33, %v1829_v33 }
  0x5f   :  { %272 = vmatpush.bf16.msra.mxu0 %v1859_v36  ;;  %333 = vmatpush.bf16.msra.mxu1 %v1863_v37  ;;  %v221_v52 = vpack.c.bf16 %v220_v50, %v220_v50 }
  0x61   :  { %s351_s9 = scalar_lea.hbm %s2149_s2, %s988_s28 }
  0x62   :  { %s359_s5 = sshll.u32 %s351_s9, 4  ;;  %s366_s15 = scalar_lea.hbm %s2149_s2, %s989_s29  ;;  %s360_s5 = int_to_ptr.hbm [resolvable:$true] %s359_s5 }
  0x63   :  { %273 = vmatpush.bf16.msra.mxu0 %v1867_v38  ;;  %334 = vmatpush.bf16.msra.mxu1 %v1871_v39  ;;  %s374_s16 = sshll.u32 %s366_s15, 4  ;;  %s1318_s17 = sshra.s32 %s360_s5, 4  ;;  %s1319_s17 = int_to_ptr.hbm [resolvable:$true] %s1318_s17  ;;  %s375_s16 = int_to_ptr.hbm [resolvable:$true] %s374_s16 }
  0x64   :  { %s1320_s18 = scalar_lea.hbm %s1319_s17, 1  ;;  %p1323_p7 = scmp.lt.s32.totalorder %s1319_s17, %s2149_s2 }
  0x65   :  { %p1321_p6 = scmp.ne.s32.totalorder %s1319_s17, %s1320_s18  ;;  %p1324_p8 = scmp.lt.s32.totalorder %s1801_s24, %s1320_s18 }
  0x67   :  { %274 = vmatpush.bf16.msra.mxu0 %v1875_v40  ;;  %335 = vmatpush.bf16.msra.mxu1 %v1879_v41  ;;  %p1325_p9 = por %p1324_p8, %p1323_p7 }
  0x69   :  { %p1326_p10 = pnand %p1325_p9, %p1321_p6 }
  0x6b   :  { %275 = vmatpush.bf16.msra.mxu0 %v1885_v42  ;;  %336 = vmatpush.bf16.msra.mxu1 %v1889_v43 }
  0x6f   :  { %276 = vmatpush.bf16.msra.mxu0 %v1895_v44  ;;  %337 = vmatpush.bf16.msra.mxu1 %v1899_v45 }
  0x73   :  { %277 = vmatpush.bf16.msra.mxu0 %v1905_v46  ;;  %338 = vmatpush.bf16.msra.mxu1 %v1909_v47 }
  0x77   :  { %278 = vmatpush.bf16.msra.mxu0 %v1915_v48  ;;  %339 = vmatpush.bf16.msra.mxu1 %v1919_v49 }
  0x7a   :  { %279 = vmatmul.bf16.vlgmr.msra.gmra.mxu0 %v222_v51  ;;  %340 = vmatmul.bf16.vlgmr.msra.gmra.mxu1 %v221_v52 }
  0x7b   :  { %1329 = shalt.err (!%p1326_p10)  }
  0x7c   :  { %364 = dma.hbm_to_vmem [thread:$0]  %s360_s5, 16, %s1766_s11, [#allocation3] }
  0x7d   :  { %s1342_s1 = sshra.s32 %s375_s16, 4  ;;  %s1343_s1 = int_to_ptr.hbm [resolvable:$true] %s1342_s1 }
  0x7e   :  { %s1344_s20 = scalar_lea.hbm %s1343_s1, 1  ;;  %p1347_p12 = scmp.lt.s32.totalorder %s1343_s1, %s2149_s2 }
  0x7f   :  { %p1345_p11 = scmp.ne.s32.totalorder %s1343_s1, %s1344_s20  ;;  %p1348_p13 = scmp.lt.s32.totalorder %s1801_s24, %s1344_s20 }
  0x81   :  { %p1349_p0 = por %p1348_p13, %p1347_p12 }
  0x83   :  { %p1350_p1 = pnand %p1349_p0, %p1345_p11 }
  0x85   :  { %1353 = shalt.err (!%p1350_p1)  }
  0x86   :  { %379 = dma.hbm_to_vmem [thread:$0]  %s375_s16, 16, %s1777_s13, [#allocation3 + $0x1]  ;;  %v1942_v53 = vperm.slane %v1824_v32, 0 }
  0xf7   :  { %v280_v54 = vpop.f32.mrf.mxu0  ;;  %v341_v55 = vpop.f32.mrf.mxu1 }
  0xf8   :  { %v342_v56 = vadd.f32 %v341_v55, %v280_v54 }
  0xfa   :  { %v348_v57 = vadd.f32 %v1942_v53, %v342_v56 }
  0xfc   :  { %1073 = vtanh.f32 %v348_v57 }
  0xff   :  { %v282_v58 = vpop.f32.mrf.mxu0  ;;  %v343_v59 = vpop.f32.mrf.mxu1 }
 0x102   :  { %v1074_v60 = vpop.eup %1073 }
 0x103   :  { %1642 = dma.done.wait [#allocation3 + $0x2], 16 }
 0x104   :  { %1643 = vsyncadd [#allocation3 + $0x2], 4294967280  ;;  %387 = vmatpush.bf16.msra.mxu2 %v1851_v34  ;;  %400 = vmatpush.bf16.msra.mxu3 %v1855_v35 }
 0x105   :  { %1644 = dma.done.wait [#allocation3 + $0x3], 16 }
 0x106   :  { %1645 = vsyncadd [#allocation3 + $0x3], 4294967280  ;;  %v384_v61 = vld [vmem:[#allocation2 + $0x2] sm:$0x3]  ;;  %v386_v62 = vpack.c.bf16 %v1074_v60, %v1074_v60  ;;  %s990_s6 = sld [smem:[#allocation4 + $0x3]] }
 0x107   :  { %v385_v63 = vpack.c.bf16 %v384_v61, %v384_v61  ;;  %s991_s23 = sld [smem:[#allocation4 + $0x83]] }
 0x108   :  { %388 = vmatpush.bf16.msra.mxu2 %v1859_v36  ;;  %401 = vmatpush.bf16.msra.mxu3 %v1863_v37 }
 0x10c   :  { %389 = vmatpush.bf16.msra.mxu2 %v1867_v38  ;;  %402 = vmatpush.bf16.msra.mxu3 %v1871_v39  ;;  %s416_s0 = scalar_lea.hbm %s2149_s2, %s990_s6 }
 0x10d   :  { %s424_s27 = sshll.u32 %s416_s0, 4  ;;  %s431_s30 = scalar_lea.hbm %s2149_s2, %s991_s23  ;;  %s425_s27 = int_to_ptr.hbm [resolvable:$true] %s424_s27 }
 0x10e   :  { %s439_s3 = sshll.u32 %s431_s30, 4  ;;  %s1366_s9 = sshra.s32 %s425_s27, 4  ;;  %s1367_s9 = int_to_ptr.hbm [resolvable:$true] %s1366_s9  ;;  %s440_s3 = int_to_ptr.hbm [resolvable:$true] %s439_s3 }
 0x10f   :  { %s1368_s5 = scalar_lea.hbm %s1367_s9, 1  ;;  %p1371_p3 = scmp.lt.s32.totalorder %s1367_s9, %s2149_s2 }
 0x110   :  { %390 = vmatpush.bf16.msra.mxu2 %v1875_v40  ;;  %403 = vmatpush.bf16.msra.mxu3 %v1879_v41  ;;  %p1369_p2 = scmp.ne.s32.totalorder %s1367_s9, %s1368_s5  ;;  %p1372_p4 = scmp.lt.s32.totalorder %s1801_s24, %s1368_s5 }
 0x112   :  { %p1373_p5 = por %p1372_p4, %p1371_p3 }
 0x114   :  { %391 = vmatpush.bf16.msra.mxu2 %v1885_v42  ;;  %404 = vmatpush.bf16.msra.mxu3 %v1889_v43  ;;  %p1374_p6 = pnand %p1373_p5, %p1369_p2 }
 0x118   :  { %392 = vmatpush.bf16.msra.mxu2 %v1895_v44  ;;  %405 = vmatpush.bf16.msra.mxu3 %v1899_v45 }
 0x11c   :  { %393 = vmatpush.bf16.msra.mxu2 %v1905_v46  ;;  %406 = vmatpush.bf16.msra.mxu3 %v1909_v47 }
 0x120   :  { %394 = vmatpush.bf16.msra.mxu2 %v1915_v48  ;;  %407 = vmatpush.bf16.msra.mxu3 %v1919_v49 }
 0x123   :  { %395 = vmatmul.bf16.vlgmr.msra.gmra.mxu2 %v386_v62  ;;  %408 = vmatmul.bf16.vlgmr.msra.gmra.mxu3 %v385_v63 }
 0x124   :  { %1377 = shalt.err (!%p1374_p6)  }
 0x125   :  { %429 = dma.hbm_to_vmem [thread:$0]  %s425_s27, 16, %s1831_s10, [#allocation3 + $0x2] }
 0x126   :  { %s1390_s15 = sshra.s32 %s440_s3, 4  ;;  %s1391_s15 = int_to_ptr.hbm [resolvable:$true] %s1390_s15 }
 0x127   :  { %s1392_s16 = scalar_lea.hbm %s1391_s15, 1  ;;  %p1395_p8 = scmp.lt.s32.totalorder %s1391_s15, %s2149_s2 }
 0x128   :  { %p1393_p7 = scmp.ne.s32.totalorder %s1391_s15, %s1392_s16  ;;  %p1396_p9 = scmp.lt.s32.totalorder %s1801_s24, %s1392_s16 }
 0x12a   :  { %p1397_p10 = por %p1396_p9, %p1395_p8 }
 0x12c   :  { %p1398_p11 = pnand %p1397_p10, %p1393_p7 }
 0x12e   :  { %1401 = shalt.err (!%p1398_p11)  }
 0x12f   :  { %444 = dma.hbm_to_vmem [thread:$0]  %s440_s3, 16, %s1836_s14, [#allocation3 + $0x3] }
 0x1a6   :  { %v396_v0 = vpop.f32.mrf.mxu2  ;;  %v409_v1 = vpop.f32.mrf.mxu3 }
 0x1a7   :  { %v410_v2 = vadd.f32 %v409_v1, %v396_v0 }
 0x1a9   :  { %v413_v3 = vadd.f32 %v410_v2, %v1942_v53 }
 0x1ab   :  { %1075 = vtanh.f32 %v413_v3 }
 0x1ae   :  { %v398_v4 = vpop.f32.mrf.mxu2  ;;  %v411_v5 = vpop.f32.mrf.mxu3 }
 0x1b1   :  { %v1076_v6 = vpop.eup %1075 }
 0x1b2   :  { %1646 = dma.done.wait [#allocation3], 16 }
 0x1b3   :  { %1647 = vsyncadd [#allocation3], 4294967280  ;;  %452 = vmatpush.bf16.msrb.mxu0 %v1851_v34  ;;  %465 = vmatpush.bf16.msrb.mxu1 %v1855_v35 }
 0x1b4   :  { %1648 = dma.done.wait [#allocation3 + $0x1], 16 }
 0x1b5   :  { %1649 = vsyncadd [#allocation3 + $0x1], 4294967280  ;;  %v449_v7 = vld [vmem:[#allocation2] sm:$0x3]  ;;  %s992_s19 = sld [smem:[#allocation4 + $0x4]]  ;;  %v451_v8 = vpack.c.bf16 %v1076_v6, %v1076_v6 }
 0x1b6   :  { %v450_v9 = vpack.c.bf16 %v449_v7, %v449_v7  ;;  %s993_s4 = sld [smem:[#allocation4 + $0x84]] }
 0x1b7   :  { %453 = vmatpush.bf16.msrb.mxu0 %v1859_v36  ;;  %466 = vmatpush.bf16.msrb.mxu1 %v1863_v37 }
 0x1bb   :  { %454 = vmatpush.bf16.msrb.mxu0 %v1867_v38  ;;  %467 = vmatpush.bf16.msrb.mxu1 %v1871_v39  ;;  %s481_s21 = scalar_lea.hbm %s2149_s2, %s992_s19 }
 0x1bc   :  { %s489_s22 = sshll.u32 %s481_s21, 4  ;;  %s496_s25 = scalar_lea.hbm %s2149_s2, %s993_s4  ;;  %s490_s22 = int_to_ptr.hbm [resolvable:$true] %s489_s22 }
 0x1bd   :  { %s504_s26 = sshll.u32 %s496_s25, 4  ;;  %s1414_s0 = sshra.s32 %s490_s22, 4  ;;  %s1415_s0 = int_to_ptr.hbm [resolvable:$true] %s1414_s0  ;;  %s505_s26 = int_to_ptr.hbm [resolvable:$true] %s504_s26 }
 0x1be   :  { %s1416_s27 = scalar_lea.hbm %s1415_s0, 1  ;;  %p1419_p13 = scmp.lt.s32.totalorder %s1415_s0, %s2149_s2 }
 0x1bf   :  { %455 = vmatpush.bf16.msrb.mxu0 %v1875_v40  ;;  %468 = vmatpush.bf16.msrb.mxu1 %v1879_v41  ;;  %p1417_p12 = scmp.ne.s32.totalorder %s1415_s0, %s1416_s27  ;;  %p1420_p0 = scmp.lt.s32.totalorder %s1801_s24, %s1416_s27 }
 0x1c1   :  { %p1421_p1 = por %p1420_p0, %p1419_p13 }
 0x1c3   :  { %456 = vmatpush.bf16.msrb.mxu0 %v1885_v42  ;;  %469 = vmatpush.bf16.msrb.mxu1 %v1889_v43  ;;  %p1422_p2 = pnand %p1421_p1, %p1417_p12 }
 0x1c7   :  { %457 = vmatpush.bf16.msrb.mxu0 %v1895_v44  ;;  %470 = vmatpush.bf16.msrb.mxu1 %v1899_v45 }
 0x1cb   :  { %458 = vmatpush.bf16.msrb.mxu0 %v1905_v46  ;;  %471 = vmatpush.bf16.msrb.mxu1 %v1909_v47 }
 0x1cf   :  { %459 = vmatpush.bf16.msrb.mxu0 %v1915_v48  ;;  %472 = vmatpush.bf16.msrb.mxu1 %v1919_v49 }
 0x1d2   :  { %460 = vmatmul.bf16.vlgmr.msrb.gmra.mxu0 %v451_v8  ;;  %473 = vmatmul.bf16.vlgmr.msrb.gmra.mxu1 %v450_v9 }
 0x1d3   :  { %1425 = shalt.err (!%p1422_p2)  }
 0x1d4   :  { %494 = dma.hbm_to_vmem [thread:$0]  %s490_s22, 16, %s1766_s11, [#allocation3] }
 0x1d5   :  { %s1438_s30 = sshra.s32 %s505_s26, 4  ;;  %s1439_s30 = int_to_ptr.hbm [resolvable:$true] %s1438_s30 }
 0x1d6   :  { %s1440_s3 = scalar_lea.hbm %s1439_s30, 1  ;;  %p1443_p4 = scmp.lt.s32.totalorder %s1439_s30, %s2149_s2 }
 0x1d7   :  { %p1441_p3 = scmp.ne.s32.totalorder %s1439_s30, %s1440_s3  ;;  %p1444_p5 = scmp.lt.s32.totalorder %s1801_s24, %s1440_s3 }
 0x1d9   :  { %p1445_p6 = por %p1444_p5, %p1443_p4 }
 0x1db   :  { %p1446_p7 = pnand %p1445_p6, %p1441_p3 }
 0x1dd   :  { %1449 = shalt.err (!%p1446_p7)  }
 0x1de   :  { %509 = dma.hbm_to_vmem [thread:$0]  %s505_s26, 16, %s1777_s13, [#allocation3 + $0x1] }
 0x24f   :  { %v461_v10 = vpop.f32.mrf.mxu0  ;;  %v474_v11 = vpop.f32.mrf.mxu1 }
 0x250   :  { %v475_v12 = vadd.f32 %v474_v11, %v461_v10 }
 0x252   :  { %v478_v13 = vadd.f32 %v475_v12, %v1942_v53 }
 0x254   :  { %1077 = vtanh.f32 %v478_v13 }
 0x257   :  { %v463_v14 = vpop.f32.mrf.mxu0  ;;  %v476_v15 = vpop.f32.mrf.mxu1 }
 0x25a   :  { %v1078_v16 = vpop.eup %1077 }
 0x25b   :  { %1650 = dma.done.wait [#allocation3 + $0x2], 16 }
 0x25c   :  { %1651 = vsyncadd [#allocation3 + $0x2], 4294967280  ;;  %517 = vmatpush.bf16.msrb.mxu2 %v1851_v34  ;;  %530 = vmatpush.bf16.msrb.mxu3 %v1855_v35 }
 0x25d   :  { %1652 = dma.done.wait [#allocation3 + $0x3], 16 }
 0x25e   :  { %1653 = vsyncadd [#allocation3 + $0x3], 4294967280  ;;  %v514_v17 = vld [vmem:[#allocation2 + $0x2] sm:$0x3]  ;;  %v516_v18 = vpack.c.bf16 %v1078_v16, %v1078_v16  ;;  %s994_s7 = sld [smem:[#allocation4 + $0x5]] }
 0x25f   :  { %v515_v19 = vpack.c.bf16 %v514_v17, %v514_v17  ;;  %s995_s12 = sld [smem:[#allocation4 + $0x85]] }
 0x260   :  { %518 = vmatpush.bf16.msrb.mxu2 %v1859_v36  ;;  %531 = vmatpush.bf16.msrb.mxu3 %v1863_v37 }
 0x264   :  { %519 = vmatpush.bf16.msrb.mxu2 %v1867_v38  ;;  %532 = vmatpush.bf16.msrb.mxu3 %v1871_v39  ;;  %s546_s17 = scalar_lea.hbm %s2149_s2, %s994_s7 }
 0x265   :  { %s554_s18 = sshll.u32 %s546_s17, 4  ;;  %s561_s1 = scalar_lea.hbm %s2149_s2, %s995_s12  ;;  %s555_s18 = int_to_ptr.hbm [resolvable:$true] %s554_s18 }
 0x266   :  { %s569_s20 = sshll.u32 %s561_s1, 4  ;;  %s1462_s21 = sshra.s32 %s555_s18, 4  ;;  %s1463_s21 = int_to_ptr.hbm [resolvable:$true] %s1462_s21  ;;  %s570_s20 = int_to_ptr.hbm [resolvable:$true] %s569_s20 }
 0x267   :  { %s1464_s22 = scalar_lea.hbm %s1463_s21, 1  ;;  %p1467_p9 = scmp.lt.s32.totalorder %s1463_s21, %s2149_s2 }
 0x268   :  { %520 = vmatpush.bf16.msrb.mxu2 %v1875_v40  ;;  %533 = vmatpush.bf16.msrb.mxu3 %v1879_v41  ;;  %p1465_p8 = scmp.ne.s32.totalorder %s1463_s21, %s1464_s22  ;;  %p1468_p10 = scmp.lt.s32.totalorder %s1801_s24, %s1464_s22 }
 0x26a   :  { %p1469_p11 = por %p1468_p10, %p1467_p9 }
 0x26c   :  { %521 = vmatpush.bf16.msrb.mxu2 %v1885_v42  ;;  %534 = vmatpush.bf16.msrb.mxu3 %v1889_v43  ;;  %p1470_p12 = pnand %p1469_p11, %p1465_p8 }
 0x270   :  { %522 = vmatpush.bf16.msrb.mxu2 %v1895_v44  ;;  %535 = vmatpush.bf16.msrb.mxu3 %v1899_v45 }
 0x274   :  { %523 = vmatpush.bf16.msrb.mxu2 %v1905_v46  ;;  %536 = vmatpush.bf16.msrb.mxu3 %v1909_v47 }
 0x278   :  { %524 = vmatpush.bf16.msrb.mxu2 %v1915_v48  ;;  %537 = vmatpush.bf16.msrb.mxu3 %v1919_v49 }
 0x27b   :  { %525 = vmatmul.bf16.vlgmr.msrb.gmra.mxu2 %v516_v18  ;;  %538 = vmatmul.bf16.vlgmr.msrb.gmra.mxu3 %v515_v19 }
 0x27c   :  { %1473 = shalt.err (!%p1470_p12)  }
 0x27d   :  { %559 = dma.hbm_to_vmem [thread:$0]  %s555_s18, 16, %s1831_s10, [#allocation3 + $0x2] }
 0x27e   :  { %s1486_s25 = sshra.s32 %s570_s20, 4  ;;  %s1487_s25 = int_to_ptr.hbm [resolvable:$true] %s1486_s25 }
 0x27f   :  { %s1488_s26 = scalar_lea.hbm %s1487_s25, 1  ;;  %p1491_p0 = scmp.lt.s32.totalorder %s1487_s25, %s2149_s2 }
 0x280   :  { %p1489_p13 = scmp.ne.s32.totalorder %s1487_s25, %s1488_s26  ;;  %p1492_p1 = scmp.lt.s32.totalorder %s1801_s24, %s1488_s26 }
 0x282   :  { %p1493_p2 = por %p1492_p1, %p1491_p0 }
 0x284   :  { %p1494_p3 = pnand %p1493_p2, %p1489_p13 }
 0x286   :  { %1497 = shalt.err (!%p1494_p3)  }
 0x287   :  { %574 = dma.hbm_to_vmem [thread:$0]  %s570_s20, 16, %s1836_s14, [#allocation3 + $0x3] }
 0x2fe   :  { %v526_v20 = vpop.f32.mrf.mxu2  ;;  %v539_v21 = vpop.f32.mrf.mxu3 }
 0x2ff   :  { %v540_v22 = vadd.f32 %v539_v21, %v526_v20 }
 0x301   :  { %v543_v23 = vadd.f32 %v540_v22, %v1942_v53 }
 0x303   :  { %1079 = vtanh.f32 %v543_v23 }
 0x306   :  { %v528_v24 = vpop.f32.mrf.mxu2  ;;  %v541_v25 = vpop.f32.mrf.mxu3 }
 0x309   :  { %v1080_v26 = vpop.eup %1079 }
 0x30a   :  { %1654 = dma.done.wait [#allocation3], 16 }
 0x30b   :  { %1655 = vsyncadd [#allocation3], 4294967280  ;;  %582 = vmatpush.bf16.msra.mxu0 %v1851_v34  ;;  %595 = vmatpush.bf16.msra.mxu1 %v1855_v35 }
 0x30c   :  { %1656 = dma.done.wait [#allocation3 + $0x1], 16 }
 0x30d   :  { %1657 = vsyncadd [#allocation3 + $0x1], 4294967280  ;;  %v579_v27 = vld [vmem:[#allocation2] sm:$0x3]  ;;  %s996_s28 = sld [smem:[#allocation4 + $0x6]]  ;;  %v581_v28 = vpack.c.bf16 %v1080_v26, %v1080_v26 }
 0x30e   :  { %v580_v29 = vpack.c.bf16 %v579_v27, %v579_v27  ;;  %s997_s29 = sld [smem:[#allocation4 + $0x86]] }
 0x30f   :  { %583 = vmatpush.bf16.msra.mxu0 %v1859_v36  ;;  %596 = vmatpush.bf16.msra.mxu1 %v1863_v37 }
 0x313   :  { %584 = vmatpush.bf16.msra.mxu0 %v1867_v38  ;;  %597 = vmatpush.bf16.msra.mxu1 %v1871_v39  ;;  %s611_s9 = scalar_lea.hbm %s2149_s2, %s996_s28 }
 0x314   :  { %s619_s5 = sshll.u32 %s611_s9, 4  ;;  %s626_s15 = scalar_lea.hbm %s2149_s2, %s997_s29  ;;  %s620_s5 = int_to_ptr.hbm [resolvable:$true] %s619_s5 }
 0x315   :  { %s634_s16 = sshll.u32 %s626_s15, 4  ;;  %s1510_s17 = sshra.s32 %s620_s5, 4  ;;  %s1511_s17 = int_to_ptr.hbm [resolvable:$true] %s1510_s17  ;;  %s635_s16 = int_to_ptr.hbm [resolvable:$true] %s634_s16 }
 0x316   :  { %s1512_s18 = scalar_lea.hbm %s1511_s17, 1  ;;  %p1515_p5 = scmp.lt.s32.totalorder %s1511_s17, %s2149_s2 }
 0x317   :  { %585 = vmatpush.bf16.msra.mxu0 %v1875_v40  ;;  %598 = vmatpush.bf16.msra.mxu1 %v1879_v41  ;;  %p1513_p4 = scmp.ne.s32.totalorder %s1511_s17, %s1512_s18  ;;  %p1516_p6 = scmp.lt.s32.totalorder %s1801_s24, %s1512_s18 }
 0x319   :  { %p1517_p7 = por %p1516_p6, %p1515_p5 }
 0x31b   :  { %586 = vmatpush.bf16.msra.mxu0 %v1885_v42  ;;  %599 = vmatpush.bf16.msra.mxu1 %v1889_v43  ;;  %p1518_p8 = pnand %p1517_p7, %p1513_p4 }
 0x31f   :  { %587 = vmatpush.bf16.msra.mxu0 %v1895_v44  ;;  %600 = vmatpush.bf16.msra.mxu1 %v1899_v45 }
 0x323   :  { %588 = vmatpush.bf16.msra.mxu0 %v1905_v46  ;;  %601 = vmatpush.bf16.msra.mxu1 %v1909_v47 }
 0x327   :  { %589 = vmatpush.bf16.msra.mxu0 %v1915_v48  ;;  %602 = vmatpush.bf16.msra.mxu1 %v1919_v49 }
 0x32a   :  { %590 = vmatmul.bf16.vlgmr.msra.gmra.mxu0 %v581_v28  ;;  %603 = vmatmul.bf16.vlgmr.msra.gmra.mxu1 %v580_v29 }
 0x32b   :  { %1521 = shalt.err (!%p1518_p8)  }
 0x32c   :  { %624 = dma.hbm_to_vmem [thread:$0]  %s620_s5, 16, %s1766_s11, [#allocation3] }
 0x32d   :  { %s1534_s1 = sshra.s32 %s635_s16, 4  ;;  %s1535_s1 = int_to_ptr.hbm [resolvable:$true] %s1534_s1 }
 0x32e   :  { %s1536_s20 = scalar_lea.hbm %s1535_s1, 1  ;;  %p1539_p10 = scmp.lt.s32.totalorder %s1535_s1, %s2149_s2 }
 0x32f   :  { %p1537_p9 = scmp.ne.s32.totalorder %s1535_s1, %s1536_s20  ;;  %p1540_p11 = scmp.lt.s32.totalorder %s1801_s24, %s1536_s20 }
 0x331   :  { %p1541_p12 = por %p1540_p11, %p1539_p10 }
 0x333   :  { %p1542_p13 = pnand %p1541_p12, %p1537_p9 }
 0x335   :  { %1545 = shalt.err (!%p1542_p13)  }
 0x336   :  { %639 = dma.hbm_to_vmem [thread:$0]  %s635_s16, 16, %s1777_s13, [#allocation3 + $0x1] }
 0x3a7   :  { %v591_v30 = vpop.f32.mrf.mxu0  ;;  %v604_v31 = vpop.f32.mrf.mxu1 }
 0x3a8   :  { %v605_v32 = vadd.f32 %v604_v31, %v591_v30 }
 0x3aa   :  { %v608_v33 = vadd.f32 %v605_v32, %v1942_v53 }
 0x3ac   :  { %1081 = vtanh.f32 %v608_v33 }
 0x3af   :  { %v593_v50 = vpop.f32.mrf.mxu0  ;;  %v606_v51 = vpop.f32.mrf.mxu1 }
 0x3b2   :  { %v1082_v52 = vpop.eup %1081 }
 0x3b3   :  { %1658 = dma.done.wait [#allocation3 + $0x2], 16 }
 0x3b4   :  { %1659 = vsyncadd [#allocation3 + $0x2], 4294967280  ;;  %647 = vmatpush.bf16.msra.mxu2 %v1851_v34  ;;  %660 = vmatpush.bf16.msra.mxu3 %v1855_v35 }
 0x3b5   :  { %1660 = dma.done.wait [#allocation3 + $0x3], 16 }
 0x3b6   :  { %1661 = vsyncadd [#allocation3 + $0x3], 4294967280  ;;  %v644_v54 = vld [vmem:[#allocation2 + $0x2] sm:$0x3]  ;;  %v646_v55 = vpack.c.bf16 %v1082_v52, %v1082_v52  ;;  %s998_s11 = sld [smem:[#allocation4 + $0x7]] }
 0x3b7   :  { %v645_v56 = vpack.c.bf16 %v644_v54, %v644_v54  ;;  %s999_s13 = sld [smem:[#allocation4 + $0x87]] }
 0x3b8   :  { %648 = vmatpush.bf16.msra.mxu2 %v1859_v36  ;;  %661 = vmatpush.bf16.msra.mxu3 %v1863_v37 }
 0x3bc   :  { %649 = vmatpush.bf16.msra.mxu2 %v1867_v38  ;;  %662 = vmatpush.bf16.msra.mxu3 %v1871_v39  ;;  %s676_s25 = scalar_lea.hbm %s2149_s2, %s998_s11 }
 0x3bd   :  { %s684_s26 = sshll.u32 %s676_s25, 4  ;;  %s691_s28 = scalar_lea.hbm %s2149_s2, %s999_s13  ;;  %s685_s26 = int_to_ptr.hbm [resolvable:$true] %s684_s26 }
 0x3be   :  { %s699_s29 = sshll.u32 %s691_s28, 4  ;;  %s1558_s30 = sshra.s32 %s685_s26, 4  ;;  %s1559_s30 = int_to_ptr.hbm [resolvable:$true] %s1558_s30  ;;  %s700_s29 = int_to_ptr.hbm [resolvable:$true] %s699_s29 }
 0x3bf   :  { %s1560_s3 = scalar_lea.hbm %s1559_s30, 1  ;;  %p1563_p1 = scmp.lt.s32.totalorder %s1559_s30, %s2149_s2 }
 0x3c0   :  { %650 = vmatpush.bf16.msra.mxu2 %v1875_v40  ;;  %663 = vmatpush.bf16.msra.mxu3 %v1879_v41  ;;  %p1561_p0 = scmp.ne.s32.totalorder %s1559_s30, %s1560_s3  ;;  %p1564_p2 = scmp.lt.s32.totalorder %s1801_s24, %s1560_s3 }
 0x3c2   :  { %p1565_p3 = por %p1564_p2, %p1563_p1 }
 0x3c4   :  { %651 = vmatpush.bf16.msra.mxu2 %v1885_v42  ;;  %664 = vmatpush.bf16.msra.mxu3 %v1889_v43  ;;  %p1566_p4 = pnand %p1565_p3, %p1561_p0 }
 0x3c8   :  { %652 = vmatpush.bf16.msra.mxu2 %v1895_v44  ;;  %665 = vmatpush.bf16.msra.mxu3 %v1899_v45 }
 0x3cc   :  { %653 = vmatpush.bf16.msra.mxu2 %v1905_v46  ;;  %666 = vmatpush.bf16.msra.mxu3 %v1909_v47 }
 0x3d0   :  { %654 = vmatpush.bf16.msra.mxu2 %v1915_v48  ;;  %667 = vmatpush.bf16.msra.mxu3 %v1919_v49 }
 0x3d3   :  { %655 = vmatmul.bf16.vlgmr.msra.gmra.mxu2 %v646_v55  ;;  %668 = vmatmul.bf16.vlgmr.msra.gmra.mxu3 %v645_v56 }
 0x3d4   :  { %1569 = shalt.err (!%p1566_p4)  }
 0x3d5   :  { %689 = dma.hbm_to_vmem [thread:$0]  %s685_s26, 16, %s1831_s10, [#allocation3 + $0x2] }
 0x3d6   :  { %s1582_s7 = sshra.s32 %s700_s29, 4  ;;  %s1583_s7 = int_to_ptr.hbm [resolvable:$true] %s1582_s7 }
 0x3d7   :  { %s1584_s12 = scalar_lea.hbm %s1583_s7, 1  ;;  %p1587_p6 = scmp.lt.s32.totalorder %s1583_s7, %s2149_s2 }
 0x3d8   :  { %p1585_p5 = scmp.ne.s32.totalorder %s1583_s7, %s1584_s12  ;;  %p1588_p7 = scmp.lt.s32.totalorder %s1801_s24, %s1584_s12 }
 0x3da   :  { %p1589_p8 = por %p1588_p7, %p1587_p6 }
 0x3dc   :  { %p1590_p9 = pnand %p1589_p8, %p1585_p5 }
 0x3de   :  { %1593 = shalt.err (!%p1590_p9)  }
 0x3df   :  { %704 = dma.hbm_to_vmem [thread:$0]  %s700_s29, 16, %s1836_s14, [#allocation3 + $0x3] }
 0x456   :  { %v656_v57 = vpop.f32.mrf.mxu2  ;;  %v669_v58 = vpop.f32.mrf.mxu3 }
 0x457   :  { %v670_v59 = vadd.f32 %v669_v58, %v656_v57 }
 0x459   :  { %v673_v60 = vadd.f32 %v670_v59, %v1942_v53 }
 0x45b   :  { %1083 = vtanh.f32 %v673_v60 }
 0x45e   :  { %v658_v61 = vpop.f32.mrf.mxu2  ;;  %v671_v62 = vpop.f32.mrf.mxu3 }
 0x461   :  { %v1084_v63 = vpop.eup %1083 }
 0x462   :  { %1662 = dma.done.wait [#allocation3], 16 }
 0x463   :  { %1663 = vsyncadd [#allocation3], 4294967280  ;;  %712 = vmatpush.bf16.msrb.mxu0 %v1851_v34  ;;  %725 = vmatpush.bf16.msrb.mxu1 %v1855_v35 }
 0x464   :  { %1664 = dma.done.wait [#allocation3 + $0x1], 16 }
 0x465   :  { %1665 = vsyncadd [#allocation3 + $0x1], 4294967280  ;;  %v709_v0 = vld [vmem:[#allocation2] sm:$0x3]  ;;  %v711_v1 = vpack.c.bf16 %v1084_v63, %v1084_v63 }
 0x466   :  { %v710_v2 = vpack.c.bf16 %v709_v0, %v709_v0 }
 0x467   :  { %713 = vmatpush.bf16.msrb.mxu0 %v1859_v36  ;;  %726 = vmatpush.bf16.msrb.mxu1 %v1863_v37 }
 0x46b   :  { %714 = vmatpush.bf16.msrb.mxu0 %v1867_v38  ;;  %727 = vmatpush.bf16.msrb.mxu1 %v1871_v39 }
 0x46f   :  { %715 = vmatpush.bf16.msrb.mxu0 %v1875_v40  ;;  %728 = vmatpush.bf16.msrb.mxu1 %v1879_v41 }
 0x473   :  { %716 = vmatpush.bf16.msrb.mxu0 %v1885_v42  ;;  %729 = vmatpush.bf16.msrb.mxu1 %v1889_v43 }
 0x477   :  { %717 = vmatpush.bf16.msrb.mxu0 %v1895_v44  ;;  %730 = vmatpush.bf16.msrb.mxu1 %v1899_v45 }
 0x47b   :  { %718 = vmatpush.bf16.msrb.mxu0 %v1905_v46  ;;  %731 = vmatpush.bf16.msrb.mxu1 %v1909_v47 }
 0x47f   :  { %719 = vmatpush.bf16.msrb.mxu0 %v1915_v48  ;;  %732 = vmatpush.bf16.msrb.mxu1 %v1919_v49 }
 0x482   :  { %720 = vmatmul.bf16.vlgmr.msrb.gmra.mxu0 %v711_v1  ;;  %733 = vmatmul.bf16.vlgmr.msrb.gmra.mxu1 %v710_v2 }
 0x4ff   :  { %v721_v3 = vpop.f32.mrf.mxu0  ;;  %v734_v4 = vpop.f32.mrf.mxu1 }
 0x500   :  { %v735_v5 = vadd.f32 %v734_v4, %v721_v3 }
 0x502   :  { %v738_v6 = vadd.f32 %v735_v5, %v1942_v53 }
 0x504   :  { %1085 = vtanh.f32 %v738_v6 }
 0x507   :  { %v723_v7 = vpop.f32.mrf.mxu0  ;;  %v736_v8 = vpop.f32.mrf.mxu1 }
 0x50a   :  { %v1086_v9 = vpop.eup %1085 }
 0x50b   :  { %1666 = dma.done.wait [#allocation3 + $0x2], 16 }
 0x50c   :  { %1667 = vsyncadd [#allocation3 + $0x2], 4294967280  ;;  %747 = vmatpush.bf16.msrb.mxu2 %v1851_v34  ;;  %760 = vmatpush.bf16.msrb.mxu3 %v1855_v35 }
 0x50d   :  { %1668 = dma.done.wait [#allocation3 + $0x3], 16 }
 0x50e   :  { %1669 = vsyncadd [#allocation3 + $0x3], 4294967280  ;;  %v1059_v10 = vld [vmem:[#allocation12 + $0x38] sm:$0xff]  ;;  %v1058_v11 = vld [vmem:[#allocation12 + $0x30] sm:$0xff]  ;;  %s1684_s2 = smov [#allocation15]   ;;  %s865_s17 = sshll.u32 %s2155_s8, 4  ;;  %s866_s17 = int_to_ptr.hbm [resolvable:$true] %s865_s17 }
 0x50f   :  { %844 = vmatpush.bf16.msra.mxu0 %v1059_v10  ;;  %v1057_v34 = vld [vmem:[#allocation12 + $0x28] sm:$0xff]  ;;  %v1056_v35 = vld [vmem:[#allocation12 + $0x20] sm:$0xff]  ;;  %s863_s24 = sshll.u32 %s1684_s2, 4  ;;  %s864_s24 = int_to_ptr.vmem [resolvable:$true] %s863_s24 }
 0x510   :  { %748 = vmatpush.bf16.msrb.mxu2 %v1859_v36  ;;  %761 = vmatpush.bf16.msrb.mxu3 %v1863_v37  ;;  %v1055_v36 = vld [vmem:[#allocation12 + $0x18] sm:$0xff] }
 0x511   :  { %v744_v37 = vld [vmem:[#allocation2 + $0x2] sm:$0x3] }
 0x513   :  { %845 = vmatpush.bf16.msra.mxu0 %v1058_v11 }
 0x514   :  { %749 = vmatpush.bf16.msrb.mxu2 %v1867_v38  ;;  %762 = vmatpush.bf16.msrb.mxu3 %v1871_v39  ;;  %v746_v38 = vpack.c.bf16 %v1086_v9, %v1086_v9  ;;  %v745_v39 = vpack.c.bf16 %v744_v37, %v744_v37 }
 0x517   :  { %846 = vmatpush.bf16.msra.mxu0 %v1057_v34 }
 0x518   :  { %750 = vmatpush.bf16.msrb.mxu2 %v1875_v40  ;;  %763 = vmatpush.bf16.msrb.mxu3 %v1879_v41  ;;  %v1054_v40 = vld [vmem:[#allocation12 + $0x10] sm:$0xff]  ;;  %v1053_v41 = vld [vmem:[#allocation12 + $0x8] sm:$0xff] }
 0x51b   :  { %847 = vmatpush.bf16.msra.mxu0 %v1056_v35 }
 0x51c   :  { %751 = vmatpush.bf16.msrb.mxu2 %v1885_v42  ;;  %764 = vmatpush.bf16.msrb.mxu3 %v1889_v43  ;;  %v1052_v42 = vld [vmem:[#allocation12] sm:$0xff] }
 0x51f   :  { %848 = vmatpush.bf16.msra.mxu0 %v1055_v36 }
 0x520   :  { %752 = vmatpush.bf16.msrb.mxu2 %v1895_v44  ;;  %765 = vmatpush.bf16.msrb.mxu3 %v1899_v45 }
 0x523   :  { %849 = vmatpush.bf16.msra.mxu0 %v1054_v40 }
 0x524   :  { %753 = vmatpush.bf16.msrb.mxu2 %v1905_v46  ;;  %766 = vmatpush.bf16.msrb.mxu3 %v1909_v47 }
 0x527   :  { %850 = vmatpush.bf16.msra.mxu0 %v1053_v41 }
 0x528   :  { %754 = vmatpush.bf16.msrb.mxu2 %v1915_v48  ;;  %767 = vmatpush.bf16.msrb.mxu3 %v1919_v49  ;;  %v1087_v49 = vld [vmem:[#allocation14] ss:$0 sm:$0xff] }
 0x52b   :  { %755 = vmatmul.bf16.vlgmr.msrb.gmra.mxu2 %v746_v38  ;;  %768 = vmatmul.bf16.vlgmr.msrb.gmra.mxu3 %v745_v39 }
 0x52c   :  { %851 = vmatpush.bf16.msra.mxu0 %v1052_v42 }
 0x5ae   :  { %v756_v43 = vpop.f32.mrf.mxu2  ;;  %v769_v44 = vpop.f32.mrf.mxu3 }
 0x5af   :  { %v770_v45 = vadd.f32 %v769_v44, %v756_v43 }
 0x5b1   :  { %v773_v46 = vadd.f32 %v770_v45, %v1942_v53 }
 0x5b3   :  { %1088 = vtanh.f32 %v773_v46 }
 0x5b6   :  { %v758_v47 = vpop.f32.mrf.mxu2  ;;  %v771_v12 = vpop.f32.mrf.mxu3 }
 0x5b9   :  { %v1089_v13 = vpop.eup %1088 }
 0x5ba   :  { %v775_v48 = vpack.c.bf16 %v1089_v13, %v1089_v13 }
 0x5bc   :  { %852 = vmatmul.bf16.vlgmr.msra.gmra.mxu0 %v775_v48 }
 0x639   :  { %v853_v14 = vpop.f32.mrf.mxu0 }
 0x63a   :  { %v854_v15 = vadd.f32 %v1087_v49, %v853_v14 }
 0x63c   :  { %857 = vst [vmem:[#allocation15] sm:$0x3] %v854_v15 }
 0x63d   :  { %868 = dma.vmem_to_hbm [thread:$0]  %s864_s24, 32, %s866_s17, [#allocation6]  }
 0x641   :  { %v855_v53 = vpop.f32.mrf.mxu0 }
 0x642   :  { %1670 = dma.done.wait [#allocation6], 32  }
 0x643   :  { %1671 = vsyncadd [#allocation6], 4294967264 }
 0x644   :  { %873 = vsyncpa [#allocation5], 1 }
 0x645   :  { %874 = vsyncpa [#allocation10], 1 }
 0x646   :  { %875 = vsyncpa [#allocation13], 1 }
 0x647   :  { %876 = vsyncpa [#allocation6], 1 }
 0x648   :  { %877 = vsyncpa [#allocation7], 1 }
 0x649   :  { %878 = vsyncmov [#allocation3] }
 0x64c   :  { %s879_s18 = vpop.sfrf %878 }
 0x64d   :  { %p1032_p10 = scmp.ne.s32.totalorder %s879_s18, 0 }
 0x64f   :  { %883 = shalt.err (%p1032_p10)  }
 0x650   :  { %885 = vsyncmov [#allocation3 + $0x1] }
 0x653   :  { %s886_s8 = vpop.sfrf %885 }
 0x654   :  { %p1033_p11 = scmp.ne.s32.totalorder %s886_s8, 0 }
 0x656   :  { %890 = shalt.err (%p1033_p11)  }
 0x657   :  { %892 = vsyncmov [#allocation3 + $0x2] }
 0x65a   :  { %s893_s19 = vpop.sfrf %892 }
 0x65b   :  { %p1034_p12 = scmp.ne.s32.totalorder %s893_s19, 0 }
 0x65d   :  { %897 = shalt.err (%p1034_p12)  }
 0x65e   :  { %899 = vsyncmov [#allocation3 + $0x3] }
 0x661   :  { %s900_s4 = vpop.sfrf %899 }
 0x662   :  { %p1035_p13 = scmp.ne.s32.totalorder %s900_s4, 0 }
 0x664   :  { %904 = shalt.err (%p1035_p13)  }

</bundles_post_ra>
